<compile_context>
chip_gen: v7x
topology: tpu7x:2x2x1
jax: 0.10.0
libtpu: 0.0.40
codegen_flags: <defaults>
</compile_context>

<pallas_src>
import functools
import math

import jax
import jax.numpy as jnp
from jax.experimental import pallas as pl
from jax.experimental.pallas import tpu as pltpu

BN_EPS = 1e-5  # nn.BatchNorm1d default eps


def transformer_kernel(x_ref, wqkv_ref, wo_ref, g1_ref, be1_ref,
                       w1_ref, b1_ref, w2_ref, b2_ref, g2_ref, be2_ref,
                       o_ref, *, L, B, S, H, Dk, Dv):
    """Entire L-layer Transformer stack for the whole (small) batch in VMEM."""
    N, E = o_ref.shape
    h = x_ref[...]                                           # (N, E) f32, N = B*S

    for l in range(L):                                       # static unroll: layers fused
        # ---- hoist per-layer params: load each row/matrix exactly once ----
        w_qkv = wqkv_ref[l]          # (E, H*(2Dk+Dv)) bf16; Q cols pre-scaled by 1/sqrt(Dk)
        w_out = wo_ref[l]            # (H*Dv, E) bf16
        w1 = w1_ref[l]               # (E, F)  bf16
        w2 = w2_ref[l]               # (F, E)  bf16
        b1 = b1_ref[l]               # (1, F)  f32
        b2 = b2_ref[l]               # (1, E)  f32
        g1 = g1_ref[l]               # (1, E)  f32
        be1 = be1_ref[l]             # (1, E)  f32
        g2 = g2_ref[l]               # (1, E)  f32
        be2 = be2_ref[l]             # (1, E)  f32

        # ---- fused Q/K/V projection: one MXU matmul (bf16 operands, f32 acc) ----
        qkv = jnp.dot(h.astype(jnp.bfloat16), w_qkv,
                      preferred_element_type=jnp.float32)    # (N, H*(2Dk+Dv))

        # ---- attention: all heads batched along a single (H*B) leading dim ----
        # Columns of qkv are head-major; per-head lane slices are stacked along
        # the batch axis (leading-dim concat, no second-minor transposes).
        q = jnp.concatenate(
            [qkv[:, hh * Dk:(hh + 1) * Dk].reshape(B, S, Dk) for hh in range(H)],
            axis=0).astype(jnp.bfloat16)                      # (H*B, S, Dk)
        k = jnp.concatenate(
            [qkv[:, H * Dk + hh * Dk:H * Dk + (hh + 1) * Dk].reshape(B, S, Dk)
             for hh in range(H)],
            axis=0).astype(jnp.bfloat16)                      # (H*B, S, Dk)
        v = jnp.concatenate(
            [qkv[:, 2 * H * Dk + hh * Dv:2 * H * Dk + (hh + 1) * Dv].reshape(B, S, Dv)
             for hh in range(H)],
            axis=0).astype(jnp.bfloat16)                      # (H*B, S, Dv)

        # scores = (scaled Q) @ K^T  -- scale already folded into W_q columns.
        scores = jnp.einsum('gqd,gkd->gqk', q, k,
                            preferred_element_type=jnp.float32)   # (H*B, S, S)
        m = jnp.max(scores, axis=-1, keepdims=True)
        p = jnp.exp(scores - m)
        inv = pl.reciprocal(jnp.sum(p, axis=-1, keepdims=True), approx=True)
        attn = (p * inv).astype(jnp.bfloat16)                 # softmax (f32 math -> bf16 MXU)
        ctx = jnp.einsum('gqk,gkd->gqd', attn, v,
                         preferred_element_type=jnp.float32)      # (H*B, S, Dv)

        # Re-assemble heads to (N, H*Dv) head-major columns
        # (== PyTorch heads.permute(1,2,0,3).view(-1, H*Dv)); leading slices only.
        heads_cat = jnp.concatenate(
            [ctx[hh * B:(hh + 1) * B] for hh in range(H)], axis=-1).reshape(N, H * Dv)
        mha = jnp.dot(heads_cat.astype(jnp.bfloat16), w_out,
                      preferred_element_type=jnp.float32)     # (N, E)

        # ---- skip connection 1 + BatchNorm1d (training-mode, one-pass stats) ----
        h1 = h + mha
        mean1 = jnp.mean(h1, axis=0, keepdims=True)
        var1 = jnp.maximum(
            jnp.mean(h1 * h1, axis=0, keepdims=True) - mean1 * mean1, 0.0)
        n1 = (h1 - mean1) * jax.lax.rsqrt(var1 + BN_EPS) * g1 + be1

        # ---- feed-forward (Linear -> ReLU -> Linear) with skip ----
        ff = jnp.dot(n1.astype(jnp.bfloat16), w1,
                     preferred_element_type=jnp.float32) + b1
        ff = jnp.maximum(ff, 0.0)
        ff = jnp.dot(ff.astype(jnp.bfloat16), w2,
                     preferred_element_type=jnp.float32) + b2
        h2 = n1 + ff

        # ---- BatchNorm1d #2 (one-pass stats) ----
        mean2 = jnp.mean(h2, axis=0, keepdims=True)
        var2 = jnp.maximum(
            jnp.mean(h2 * h2, axis=0, keepdims=True) - mean2 * mean2, 0.0)
        h = (h2 - mean2) * jax.lax.rsqrt(var2 + BN_EPS) * g2 + be2

    o_ref[...] = h


def transformer_forward(x, stacked_params, *, L, H):
    """x: (B, S, E) f32; stacked_params: tuple of arrays with leading L dim."""
    B, S, E = x.shape
    Dk = Dv = E // H
    N = B * S
    kernel = functools.partial(
        transformer_kernel, L=L, B=B, S=S, H=H, Dk=Dk, Dv=Dv)
    n_in = 1 + len(stacked_params)
    # Grid-less call: whole problem resident in VMEM (<1 MiB here).
    # TODO(synk): for large B*S / E / L, switch to a row-parallel grid (v7x
    # 2 TensorCores) + per-layer weight-streaming BlockSpecs.
    out = pl.pallas_call(
        kernel,
        out_shape=jax.ShapeDtypeStruct((N, E), jnp.float32),
        in_specs=[pl.BlockSpec(memory_space=pltpu.MemorySpace.VMEM)] * n_in,
        out_specs=pl.BlockSpec(memory_space=pltpu.MemorySpace.VMEM),
    )(x.reshape(N, E), *stacked_params)
    return out.reshape(B, S, E)


def init_layer_params(key, E, H, Dk, Dv, F):
    """Deterministic init matching the PyTorch parameter shapes / init ranges."""
    ks = jax.random.split(key, 8)
    s_k = 1.0 / math.sqrt(Dk)
    s_v = 1.0 / math.sqrt(Dv)
    s_e = 1.0 / math.sqrt(E)
    s_f = 1.0 / math.sqrt(F)
    # MultiHeadAttention parameters: uniform(-1/sqrt(last_dim), +..)
    wq = jax.random.uniform(ks[0], (H, E, Dk), jnp.float32, -s_k, s_k)
    wk = jax.random.uniform(ks[1], (H, E, Dk), jnp.float32, -s_k, s_k)
    wv = jax.random.uniform(ks[2], (H, E, Dv), jnp.float32, -s_v, s_v)
    wo = jax.random.uniform(ks[3], (H, Dv, E), jnp.float32, -s_e, s_e)
    # Feed-forward Linear layers (PyTorch default U(-1/sqrt(fan_in), ..)); stored (out,in)
    w1 = jax.random.uniform(ks[4], (F, E), jnp.float32, -s_e, s_e)
    b1 = jax.random.uniform(ks[5], (F,), jnp.float32, -s_e, s_e)
    w2 = jax.random.uniform(ks[6], (E, F), jnp.float32, -s_f, s_f)
    b2 = jax.random.uniform(ks[7], (E,), jnp.float32, -s_f, s_f)
    # BatchNorm1d default affine params (gamma=1, beta=0); running stats not tracked.
    # TODO(synk): eval-mode BatchNorm (running_mean/var) is not implemented; training-mode stats only.
    g1 = jnp.ones((E,), jnp.float32)
    be1 = jnp.zeros((E,), jnp.float32)
    g2 = jnp.ones((E,), jnp.float32)
    be2 = jnp.zeros((E,), jnp.float32)
    # Repack into kernel-friendly layouts (glue, done once in plain JAX):
    #   x @ W_query[h] for all heads == x @ (E, H*Dk); Q|K|V fused along columns.
    #   * softmax scale 1/sqrt(Dk) folded into the Q columns (saves a VPU mul/layer).
    #   * all MXU weights pre-cast to bf16 (halves DMA bytes, removes in-kernel casts).
    norm_factor = 1.0 / math.sqrt(Dk)
    wq2 = (jnp.transpose(wq, (1, 0, 2)) * norm_factor).reshape(E, H * Dk)
    wk2 = jnp.transpose(wk, (1, 0, 2)).reshape(E, H * Dk)
    wv2 = jnp.transpose(wv, (1, 0, 2)).reshape(E, H * Dv)
    w_qkv = jnp.concatenate([wq2, wk2, wv2], axis=1).astype(jnp.bfloat16)
    wo2 = wo.reshape(H * Dv, E).astype(jnp.bfloat16)          # head-major rows, as in PyTorch
    return (w_qkv, wo2,
            g1.reshape(1, E), be1.reshape(1, E),
            w1.T.astype(jnp.bfloat16), b1.reshape(1, F),      # (E, F) bf16, (1, F) f32
            w2.T.astype(jnp.bfloat16), b2.reshape(1, E),      # (F, E) bf16, (1, E) f32
            g2.reshape(1, E), be2.reshape(1, E))


def init_params(key, L, E, H, Dk, Dv, F):
    """Stack every per-layer param with a leading L dim so one pallas_call sees all layers."""
    keys = jax.random.split(key, L)
    per_layer = [init_layer_params(k, E, H, Dk, Dv, F) for k in keys]
    return tuple(jnp.stack(ps) for ps in zip(*per_layer))


if __name__ == "__main__":
    # Shapes consistent with: Transformer(n_heads=4, embed_dim=32, n_layers=2,
    # normalization='batch', feed_forward_hidden=64); input (batch=2, graph_size=8, 32).
    B, S, E, H, F, L = 2, 8, 32, 4, 64, 2
    Dk = Dv = E // H

    key = jax.random.PRNGKey(0)
    kx, kp = jax.random.split(key)
    x = jax.random.normal(kx, (B, S, E), dtype=jnp.float32)

    params = init_params(kp, L, E, H, Dk, Dv, F)
    out = transformer_forward(x, params, L=L, H=H)
    jax.block_until_ready(out)
    assert out.shape == (B, S, E) and out.dtype == jnp.float32
    assert bool(jnp.all(jnp.isfinite(out)))
    print("KERNEL_OK")
</pallas_src>

<mosaic_0001>
module attributes {stable_mosaic.version = 11 : i64} {
  func.func @transformer_kernel(%arg0: memref<16x32xf32, #tpu.memory_space<vmem>>, %arg1: memref<2x32x96xbf16, #tpu.memory_space<vmem>>, %arg2: memref<2x32x32xbf16, #tpu.memory_space<vmem>>, %arg3: memref<2x1x32xf32, #tpu.memory_space<vmem>>, %arg4: memref<2x1x32xf32, #tpu.memory_space<vmem>>, %arg5: memref<2x32x64xbf16, #tpu.memory_space<vmem>>, %arg6: memref<2x1x64xf32, #tpu.memory_space<vmem>>, %arg7: memref<2x64x32xbf16, #tpu.memory_space<vmem>>, %arg8: memref<2x1x32xf32, #tpu.memory_space<vmem>>, %arg9: memref<2x1x32xf32, #tpu.memory_space<vmem>>, %arg10: memref<2x1x32xf32, #tpu.memory_space<vmem>>, %arg11: memref<16x32xf32, #tpu.memory_space<vmem>>) attributes {dimension_semantics = [], scalar_prefetch = 0 : i64, scratch_operands = 0 : i64, tpu.core_type = #tpu.core_type<tc>} {
    %c0 = arith.constant 0 : index
    %c0_0 = arith.constant 0 : index
    %0 = vector.load %arg0[%c0, %c0_0] : memref<16x32xf32, #tpu.memory_space<vmem>>, vector<16x32xf32>
    %c0_1 = arith.constant 0 : index
    %c0_2 = arith.constant 0 : index
    %c0_3 = arith.constant 0 : index
    %1 = vector.load %arg1[%c0_1, %c0_2, %c0_3] : memref<2x32x96xbf16, #tpu.memory_space<vmem>>, vector<1x32x96xbf16>
    %2 = vector.shape_cast %1 : vector<1x32x96xbf16> to vector<32x96xbf16>
    %c0_4 = arith.constant 0 : index
    %c0_5 = arith.constant 0 : index
    %c0_6 = arith.constant 0 : index
    %3 = vector.load %arg2[%c0_4, %c0_5, %c0_6] : memref<2x32x32xbf16, #tpu.memory_space<vmem>>, vector<1x32x32xbf16>
    %4 = vector.shape_cast %3 : vector<1x32x32xbf16> to vector<32x32xbf16>
    %c0_7 = arith.constant 0 : index
    %c0_8 = arith.constant 0 : index
    %c0_9 = arith.constant 0 : index
    %5 = vector.load %arg5[%c0_7, %c0_8, %c0_9] : memref<2x32x64xbf16, #tpu.memory_space<vmem>>, vector<1x32x64xbf16>
    %6 = vector.shape_cast %5 : vector<1x32x64xbf16> to vector<32x64xbf16>
    %c0_10 = arith.constant 0 : index
    %c0_11 = arith.constant 0 : index
    %c0_12 = arith.constant 0 : index
    %7 = vector.load %arg7[%c0_10, %c0_11, %c0_12] : memref<2x64x32xbf16, #tpu.memory_space<vmem>>, vector<1x64x32xbf16>
    %8 = vector.shape_cast %7 : vector<1x64x32xbf16> to vector<64x32xbf16>
    %c0_13 = arith.constant 0 : index
    %c0_14 = arith.constant 0 : index
    %c0_15 = arith.constant 0 : index
    %9 = vector.load %arg6[%c0_13, %c0_14, %c0_15] : memref<2x1x64xf32, #tpu.memory_space<vmem>>, vector<1x1x64xf32>
    %10 = vector.shape_cast %9 : vector<1x1x64xf32> to vector<1x64xf32>
    %c0_16 = arith.constant 0 : index
    %c0_17 = arith.constant 0 : index
    %c0_18 = arith.constant 0 : index
    %11 = vector.load %arg8[%c0_16, %c0_17, %c0_18] : memref<2x1x32xf32, #tpu.memory_space<vmem>>, vector<1x1x32xf32>
    %12 = vector.shape_cast %11 : vector<1x1x32xf32> to vector<1x32xf32>
    %c0_19 = arith.constant 0 : index
    %c0_20 = arith.constant 0 : index
    %c0_21 = arith.constant 0 : index
    %13 = vector.load %arg3[%c0_19, %c0_20, %c0_21] : memref<2x1x32xf32, #tpu.memory_space<vmem>>, vector<1x1x32xf32>
    %14 = vector.shape_cast %13 : vector<1x1x32xf32> to vector<1x32xf32>
    %c0_22 = arith.constant 0 : index
    %c0_23 = arith.constant 0 : index
    %c0_24 = arith.constant 0 : index
    %15 = vector.load %arg4[%c0_22, %c0_23, %c0_24] : memref<2x1x32xf32, #tpu.memory_space<vmem>>, vector<1x1x32xf32>
    %16 = vector.shape_cast %15 : vector<1x1x32xf32> to vector<1x32xf32>
    %c0_25 = arith.constant 0 : index
    %c0_26 = arith.constant 0 : index
    %c0_27 = arith.constant 0 : index
    %17 = vector.load %arg9[%c0_25, %c0_26, %c0_27] : memref<2x1x32xf32, #tpu.memory_space<vmem>>, vector<1x1x32xf32>
    %18 = vector.shape_cast %17 : vector<1x1x32xf32> to vector<1x32xf32>
    %c0_28 = arith.constant 0 : index
    %c0_29 = arith.constant 0 : index
    %c0_30 = arith.constant 0 : index
    %19 = vector.load %arg10[%c0_28, %c0_29, %c0_30] : memref<2x1x32xf32, #tpu.memory_space<vmem>>, vector<1x1x32xf32>
    %20 = vector.shape_cast %19 : vector<1x1x32xf32> to vector<1x32xf32>
    %21 = arith.truncf %0 : vector<16x32xf32> to vector<16x32xbf16>
    %cst = arith.constant dense<0.000000e+00> : vector<16x96xf32>
    %22 = tpu.matmul %21, %2, %cst {dimension_numbers = #tpu.dot_dimension_numbers<[1], [0], [0], [1], [0, 0, 1, 1], [], []>} : vector<16x32xbf16>, vector<32x96xbf16>, vector<16x96xf32> -> vector<16x96xf32>
    %23 = vector.extract_strided_slice %22 {offsets = [0, 0], sizes = [16, 8], strides = [1, 1]} : vector<16x96xf32> to vector<16x8xf32>
    %24 = vector.shape_cast %23 : vector<16x8xf32> to vector<2x8x8xf32>
    %25 = vector.extract_strided_slice %22 {offsets = [0, 8], sizes = [16, 8], strides = [1, 1]} : vector<16x96xf32> to vector<16x8xf32>
    %26 = vector.shape_cast %25 : vector<16x8xf32> to vector<2x8x8xf32>
    %27 = vector.extract_strided_slice %22 {offsets = [0, 16], sizes = [16, 8], strides = [1, 1]} : vector<16x96xf32> to vector<16x8xf32>
    %28 = vector.shape_cast %27 : vector<16x8xf32> to vector<2x8x8xf32>
    %29 = vector.extract_strided_slice %22 {offsets = [0, 24], sizes = [16, 8], strides = [1, 1]} : vector<16x96xf32> to vector<16x8xf32>
    %30 = vector.shape_cast %29 : vector<16x8xf32> to vector<2x8x8xf32>
    %31 = tpu.concatenate %24, %26, %28, %30 in 0 : vector<2x8x8xf32>, vector<2x8x8xf32>, vector<2x8x8xf32>, vector<2x8x8xf32> -> vector<8x8x8xf32>
    %32 = arith.truncf %31 : vector<8x8x8xf32> to vector<8x8x8xbf16>
    %33 = vector.extract_strided_slice %22 {offsets = [0, 32], sizes = [16, 8], strides = [1, 1]} : vector<16x96xf32> to vector<16x8xf32>
    %34 = vector.shape_cast %33 : vector<16x8xf32> to vector<2x8x8xf32>
    %35 = vector.extract_strided_slice %22 {offsets = [0, 40], sizes = [16, 8], strides = [1, 1]} : vector<16x96xf32> to vector<16x8xf32>
    %36 = vector.shape_cast %35 : vector<16x8xf32> to vector<2x8x8xf32>
    %37 = vector.extract_strided_slice %22 {offsets = [0, 48], sizes = [16, 8], strides = [1, 1]} : vector<16x96xf32> to vector<16x8xf32>
    %38 = vector.shape_cast %37 : vector<16x8xf32> to vector<2x8x8xf32>
    %39 = vector.extract_strided_slice %22 {offsets = [0, 56], sizes = [16, 8], strides = [1, 1]} : vector<16x96xf32> to vector<16x8xf32>
    %40 = vector.shape_cast %39 : vector<16x8xf32> to vector<2x8x8xf32>
    %41 = tpu.concatenate %34, %36, %38, %40 in 0 : vector<2x8x8xf32>, vector<2x8x8xf32>, vector<2x8x8xf32>, vector<2x8x8xf32> -> vector<8x8x8xf32>
    %42 = arith.truncf %41 : vector<8x8x8xf32> to vector<8x8x8xbf16>
    %43 = vector.extract_strided_slice %22 {offsets = [0, 64], sizes = [16, 8], strides = [1, 1]} : vector<16x96xf32> to vector<16x8xf32>
    %44 = vector.shape_cast %43 : vector<16x8xf32> to vector<2x8x8xf32>
    %45 = vector.extract_strided_slice %22 {offsets = [0, 72], sizes = [16, 8], strides = [1, 1]} : vector<16x96xf32> to vector<16x8xf32>
    %46 = vector.shape_cast %45 : vector<16x8xf32> to vector<2x8x8xf32>
    %47 = vector.extract_strided_slice %22 {offsets = [0, 80], sizes = [16, 8], strides = [1, 1]} : vector<16x96xf32> to vector<16x8xf32>
    %48 = vector.shape_cast %47 : vector<16x8xf32> to vector<2x8x8xf32>
    %49 = vector.extract_strided_slice %22 {offsets = [0, 88], sizes = [16, 8], strides = [1, 1]} : vector<16x96xf32> to vector<16x8xf32>
    %50 = vector.shape_cast %49 : vector<16x8xf32> to vector<2x8x8xf32>
    %51 = tpu.concatenate %44, %46, %48, %50 in 0 : vector<2x8x8xf32>, vector<2x8x8xf32>, vector<2x8x8xf32>, vector<2x8x8xf32> -> vector<8x8x8xf32>
    %52 = arith.truncf %51 : vector<8x8x8xf32> to vector<8x8x8xbf16>
    "tpu.trace_start"() <{level = 10 : i32, message = "gqd,gkd->gqk"}> : () -> ()
    %cst_31 = arith.constant dense<0.000000e+00> : vector<8x8x8xf32>
    %53 = tpu.matmul %32, %42, %cst_31 {dimension_numbers = #tpu.dot_dimension_numbers<[2], [2], [1], [1], [0, 0, 0, 1, 1, 1], [0], [0]>} : vector<8x8x8xbf16>, vector<8x8x8xbf16>, vector<8x8x8xf32> -> vector<8x8x8xf32>
    "tpu.trace_stop"() : () -> ()
    %cst_32 = arith.constant dense<0xFF800000> : vector<8x8xf32>
    %54 = vector.multi_reduction <maximumf>, %53, %cst_32 [2] : vector<8x8x8xf32> to vector<8x8xf32>
    %55 = vector.shape_cast %54 : vector<8x8xf32> to vector<8x8x1xf32>
    %56 = vector.broadcast %55 : vector<8x8x1xf32> to vector<8x8x8xf32>
    %57 = arith.subf %53, %56 : vector<8x8x8xf32>
    %58 = math.exp %57 : vector<8x8x8xf32>
    %cst_33 = arith.constant dense<0.000000e+00> : vector<8x8xf32>
    %59 = vector.multi_reduction <add>, %58, %cst_33 [2] : vector<8x8x8xf32> to vector<8x8xf32>
    %60 = vector.shape_cast %59 : vector<8x8xf32> to vector<8x8x1xf32>
    %61 = tpu.reciprocal %60 {approx = true} : vector<8x8x1xf32> -> vector<8x8x1xf32>
    %62 = vector.broadcast %61 : vector<8x8x1xf32> to vector<8x8x8xf32>
    %63 = arith.mulf %58, %62 : vector<8x8x8xf32>
    %64 = arith.truncf %63 : vector<8x8x8xf32> to vector<8x8x8xbf16>
    "tpu.trace_start"() <{level = 10 : i32, message = "gqk,gkd->gqd"}> : () -> ()
    %cst_34 = arith.constant dense<0.000000e+00> : vector<8x8x8xf32>
    %65 = tpu.matmul %64, %52, %cst_34 {dimension_numbers = #tpu.dot_dimension_numbers<[2], [1], [1], [2], [0, 0, 0, 1, 1, 2], [0], [0]>} : vector<8x8x8xbf16>, vector<8x8x8xbf16>, vector<8x8x8xf32> -> vector<8x8x8xf32>
    "tpu.trace_stop"() : () -> ()
    %66 = vector.extract_strided_slice %65 {offsets = [0, 0, 0], sizes = [2, 8, 8], strides = [1, 1, 1]} : vector<8x8x8xf32> to vector<2x8x8xf32>
    %67 = vector.extract_strided_slice %65 {offsets = [2, 0, 0], sizes = [2, 8, 8], strides = [1, 1, 1]} : vector<8x8x8xf32> to vector<2x8x8xf32>
    %68 = vector.extract_strided_slice %65 {offsets = [4, 0, 0], sizes = [2, 8, 8], strides = [1, 1, 1]} : vector<8x8x8xf32> to vector<2x8x8xf32>
    %69 = vector.extract_strided_slice %65 {offsets = [6, 0, 0], sizes = [2, 8, 8], strides = [1, 1, 1]} : vector<8x8x8xf32> to vector<2x8x8xf32>
    %70 = tpu.concatenate %66, %67, %68, %69 in 2 : vector<2x8x8xf32>, vector<2x8x8xf32>, vector<2x8x8xf32>, vector<2x8x8xf32> -> vector<2x8x32xf32>
    %71 = vector.shape_cast %70 : vector<2x8x32xf32> to vector<16x32xf32>
    %72 = arith.truncf %71 : vector<16x32xf32> to vector<16x32xbf16>
    %cst_35 = arith.constant dense<0.000000e+00> : vector<16x32xf32>
    %73 = tpu.matmul %72, %4, %cst_35 {dimension_numbers = #tpu.dot_dimension_numbers<[1], [0], [0], [1], [0, 0, 1, 1], [], []>} : vector<16x32xbf16>, vector<32x32xbf16>, vector<16x32xf32> -> vector<16x32xf32>
    %74 = arith.addf %0, %73 : vector<16x32xf32>
    %cst_36 = arith.constant dense<0.000000e+00> : vector<32xf32>
    %75 = vector.multi_reduction <add>, %74, %cst_36 [0] : vector<16x32xf32> to vector<32xf32>
    %76 = vector.shape_cast %75 : vector<32xf32> to vector<1x32xf32>
    %cst_37 = arith.constant 1.600000e+01 : f32
    %77 = vector.broadcast %cst_37 : f32 to vector<1x32xf32>
    %78 = arith.divf %76, %77 : vector<1x32xf32>
    %79 = arith.mulf %74, %74 : vector<16x32xf32>
    %cst_38 = arith.constant dense<0.000000e+00> : vector<32xf32>
    %80 = vector.multi_reduction <add>, %79, %cst_38 [0] : vector<16x32xf32> to vector<32xf32>
    %81 = vector.shape_cast %80 : vector<32xf32> to vector<1x32xf32>
    %cst_39 = arith.constant 1.600000e+01 : f32
    %82 = vector.broadcast %cst_39 : f32 to vector<1x32xf32>
    %83 = arith.divf %81, %82 : vector<1x32xf32>
    %84 = arith.mulf %78, %78 : vector<1x32xf32>
    %85 = arith.subf %83, %84 : vector<1x32xf32>
    %cst_40 = arith.constant 0.000000e+00 : f32
    %86 = vector.broadcast %cst_40 : f32 to vector<1x32xf32>
    %87 = arith.maximumf %85, %86 : vector<1x32xf32>
    %88 = vector.broadcast %78 : vector<1x32xf32> to vector<16x32xf32>
    %89 = arith.subf %74, %88 : vector<16x32xf32>
    %cst_41 = arith.constant 9.99999974E-6 : f32
    %90 = vector.broadcast %cst_41 : f32 to vector<1x32xf32>
    %91 = arith.addf %87, %90 : vector<1x32xf32>
    %92 = math.rsqrt %91 : vector<1x32xf32>
    %93 = vector.broadcast %92 : vector<1x32xf32> to vector<16x32xf32>
    %94 = arith.mulf %89, %93 : vector<16x32xf32>
    %95 = vector.broadcast %14 : vector<1x32xf32> to vector<16x32xf32>
    %96 = arith.mulf %94, %95 : vector<16x32xf32>
    %97 = vector.broadcast %16 : vector<1x32xf32> to vector<16x32xf32>
    %98 = arith.addf %96, %97 : vector<16x32xf32>
    %99 = arith.truncf %98 : vector<16x32xf32> to vector<16x32xbf16>
    %cst_42 = arith.constant dense<0.000000e+00> : vector<16x64xf32>
    %100 = tpu.matmul %99, %6, %cst_42 {dimension_numbers = #tpu.dot_dimension_numbers<[1], [0], [0], [1], [0, 0, 1, 1], [], []>} : vector<16x32xbf16>, vector<32x64xbf16>, vector<16x64xf32> -> vector<16x64xf32>
    %101 = vector.broadcast %10 : vector<1x64xf32> to vector<16x64xf32>
    %102 = arith.addf %100, %101 : vector<16x64xf32>
    %cst_43 = arith.constant 0.000000e+00 : f32
    %103 = vector.broadcast %cst_43 : f32 to vector<16x64xf32>
    %104 = arith.maximumf %102, %103 : vector<16x64xf32>
    %105 = arith.truncf %104 : vector<16x64xf32> to vector<16x64xbf16>
    %cst_44 = arith.constant dense<0.000000e+00> : vector<16x32xf32>
    %106 = tpu.matmul %105, %8, %cst_44 {dimension_numbers = #tpu.dot_dimension_numbers<[1], [0], [0], [1], [0, 0, 1, 1], [], []>} : vector<16x64xbf16>, vector<64x32xbf16>, vector<16x32xf32> -> vector<16x32xf32>
    %107 = vector.broadcast %12 : vector<1x32xf32> to vector<16x32xf32>
    %108 = arith.addf %106, %107 : vector<16x32xf32>
    %109 = arith.addf %98, %108 : vector<16x32xf32>
    %cst_45 = arith.constant dense<0.000000e+00> : vector<32xf32>
    %110 = vector.multi_reduction <add>, %109, %cst_45 [0] : vector<16x32xf32> to vector<32xf32>
    %111 = vector.shape_cast %110 : vector<32xf32> to vector<1x32xf32>
    %cst_46 = arith.constant 1.600000e+01 : f32
    %112 = vector.broadcast %cst_46 : f32 to vector<1x32xf32>
    %113 = arith.divf %111, %112 : vector<1x32xf32>
    %114 = arith.mulf %109, %109 : vector<16x32xf32>
    %cst_47 = arith.constant dense<0.000000e+00> : vector<32xf32>
    %115 = vector.multi_reduction <add>, %114, %cst_47 [0] : vector<16x32xf32> to vector<32xf32>
    %116 = vector.shape_cast %115 : vector<32xf32> to vector<1x32xf32>
    %cst_48 = arith.constant 1.600000e+01 : f32
    %117 = vector.broadcast %cst_48 : f32 to vector<1x32xf32>
    %118 = arith.divf %116, %117 : vector<1x32xf32>
    %119 = arith.mulf %113, %113 : vector<1x32xf32>
    %120 = arith.subf %118, %119 : vector<1x32xf32>
    %cst_49 = arith.constant 0.000000e+00 : f32
    %121 = vector.broadcast %cst_49 : f32 to vector<1x32xf32>
    %122 = arith.maximumf %120, %121 : vector<1x32xf32>
    %123 = vector.broadcast %113 : vector<1x32xf32> to vector<16x32xf32>
    %124 = arith.subf %109, %123 : vector<16x32xf32>
    %cst_50 = arith.constant 9.99999974E-6 : f32
    %125 = vector.broadcast %cst_50 : f32 to vector<1x32xf32>
    %126 = arith.addf %122, %125 : vector<1x32xf32>
    %127 = math.rsqrt %126 : vector<1x32xf32>
    %128 = vector.broadcast %127 : vector<1x32xf32> to vector<16x32xf32>
    %129 = arith.mulf %124, %128 : vector<16x32xf32>
    %130 = vector.broadcast %18 : vector<1x32xf32> to vector<16x32xf32>
    %131 = arith.mulf %129, %130 : vector<16x32xf32>
    %132 = vector.broadcast %20 : vector<1x32xf32> to vector<16x32xf32>
    %133 = arith.addf %131, %132 : vector<16x32xf32>
    %c1 = arith.constant 1 : index
    %c0_51 = arith.constant 0 : index
    %c0_52 = arith.constant 0 : index
    %134 = vector.load %arg1[%c1, %c0_51, %c0_52] : memref<2x32x96xbf16, #tpu.memory_space<vmem>>, vector<1x32x96xbf16>
    %135 = vector.shape_cast %134 : vector<1x32x96xbf16> to vector<32x96xbf16>
    %c1_53 = arith.constant 1 : index
    %c0_54 = arith.constant 0 : index
    %c0_55 = arith.constant 0 : index
    %136 = vector.load %arg2[%c1_53, %c0_54, %c0_55] : memref<2x32x32xbf16, #tpu.memory_space<vmem>>, vector<1x32x32xbf16>
    %137 = vector.shape_cast %136 : vector<1x32x32xbf16> to vector<32x32xbf16>
    %c1_56 = arith.constant 1 : index
    %c0_57 = arith.constant 0 : index
    %c0_58 = arith.constant 0 : index
    %138 = vector.load %arg5[%c1_56, %c0_57, %c0_58] : memref<2x32x64xbf16, #tpu.memory_space<vmem>>, vector<1x32x64xbf16>
    %139 = vector.shape_cast %138 : vector<1x32x64xbf16> to vector<32x64xbf16>
    %c1_59 = arith.constant 1 : index
    %c0_60 = arith.constant 0 : index
    %c0_61 = arith.constant 0 : index
    %140 = vector.load %arg7[%c1_59, %c0_60, %c0_61] : memref<2x64x32xbf16, #tpu.memory_space<vmem>>, vector<1x64x32xbf16>
    %141 = vector.shape_cast %140 : vector<1x64x32xbf16> to vector<64x32xbf16>
    %c1_62 = arith.constant 1 : index
    %c0_63 = arith.constant 0 : index
    %c0_64 = arith.constant 0 : index
    %142 = vector.load %arg6[%c1_62, %c0_63, %c0_64] : memref<2x1x64xf32, #tpu.memory_space<vmem>>, vector<1x1x64xf32>
    %143 = vector.shape_cast %142 : vector<1x1x64xf32> to vector<1x64xf32>
    %c1_65 = arith.constant 1 : index
    %c0_66 = arith.constant 0 : index
    %c0_67 = arith.constant 0 : index
    %144 = vector.load %arg8[%c1_65, %c0_66, %c0_67] : memref<2x1x32xf32, #tpu.memory_space<vmem>>, vector<1x1x32xf32>
    %145 = vector.shape_cast %144 : vector<1x1x32xf32> to vector<1x32xf32>
    %c1_68 = arith.constant 1 : index
    %c0_69 = arith.constant 0 : index
    %c0_70 = arith.constant 0 : index
    %146 = vector.load %arg3[%c1_68, %c0_69, %c0_70] : memref<2x1x32xf32, #tpu.memory_space<vmem>>, vector<1x1x32xf32>
    %147 = vector.shape_cast %146 : vector<1x1x32xf32> to vector<1x32xf32>
    %c1_71 = arith.constant 1 : index
    %c0_72 = arith.constant 0 : index
    %c0_73 = arith.constant 0 : index
    %148 = vector.load %arg4[%c1_71, %c0_72, %c0_73] : memref<2x1x32xf32, #tpu.memory_space<vmem>>, vector<1x1x32xf32>
    %149 = vector.shape_cast %148 : vector<1x1x32xf32> to vector<1x32xf32>
    %c1_74 = arith.constant 1 : index
    %c0_75 = arith.constant 0 : index
    %c0_76 = arith.constant 0 : index
    %150 = vector.load %arg9[%c1_74, %c0_75, %c0_76] : memref<2x1x32xf32, #tpu.memory_space<vmem>>, vector<1x1x32xf32>
    %151 = vector.shape_cast %150 : vector<1x1x32xf32> to vector<1x32xf32>
    %c1_77 = arith.constant 1 : index
    %c0_78 = arith.constant 0 : index
    %c0_79 = arith.constant 0 : index
    %152 = vector.load %arg10[%c1_77, %c0_78, %c0_79] : memref<2x1x32xf32, #tpu.memory_space<vmem>>, vector<1x1x32xf32>
    %153 = vector.shape_cast %152 : vector<1x1x32xf32> to vector<1x32xf32>
    %154 = arith.truncf %133 : vector<16x32xf32> to vector<16x32xbf16>
    %cst_80 = arith.constant dense<0.000000e+00> : vector<16x96xf32>
    %155 = tpu.matmul %154, %135, %cst_80 {dimension_numbers = #tpu.dot_dimension_numbers<[1], [0], [0], [1], [0, 0, 1, 1], [], []>} : vector<16x32xbf16>, vector<32x96xbf16>, vector<16x96xf32> -> vector<16x96xf32>
    %156 = vector.extract_strided_slice %155 {offsets = [0, 0], sizes = [16, 8], strides = [1, 1]} : vector<16x96xf32> to vector<16x8xf32>
    %157 = vector.shape_cast %156 : vector<16x8xf32> to vector<2x8x8xf32>
    %158 = vector.extract_strided_slice %155 {offsets = [0, 8], sizes = [16, 8], strides = [1, 1]} : vector<16x96xf32> to vector<16x8xf32>
    %159 = vector.shape_cast %158 : vector<16x8xf32> to vector<2x8x8xf32>
    %160 = vector.extract_strided_slice %155 {offsets = [0, 16], sizes = [16, 8], strides = [1, 1]} : vector<16x96xf32> to vector<16x8xf32>
    %161 = vector.shape_cast %160 : vector<16x8xf32> to vector<2x8x8xf32>
    %162 = vector.extract_strided_slice %155 {offsets = [0, 24], sizes = [16, 8], strides = [1, 1]} : vector<16x96xf32> to vector<16x8xf32>
    %163 = vector.shape_cast %162 : vector<16x8xf32> to vector<2x8x8xf32>
    %164 = tpu.concatenate %157, %159, %161, %163 in 0 : vector<2x8x8xf32>, vector<2x8x8xf32>, vector<2x8x8xf32>, vector<2x8x8xf32> -> vector<8x8x8xf32>
    %165 = arith.truncf %164 : vector<8x8x8xf32> to vector<8x8x8xbf16>
    %166 = vector.extract_strided_slice %155 {offsets = [0, 32], sizes = [16, 8], strides = [1, 1]} : vector<16x96xf32> to vector<16x8xf32>
    %167 = vector.shape_cast %166 : vector<16x8xf32> to vector<2x8x8xf32>
    %168 = vector.extract_strided_slice %155 {offsets = [0, 40], sizes = [16, 8], strides = [1, 1]} : vector<16x96xf32> to vector<16x8xf32>
    %169 = vector.shape_cast %168 : vector<16x8xf32> to vector<2x8x8xf32>
    %170 = vector.extract_strided_slice %155 {offsets = [0, 48], sizes = [16, 8], strides = [1, 1]} : vector<16x96xf32> to vector<16x8xf32>
    %171 = vector.shape_cast %170 : vector<16x8xf32> to vector<2x8x8xf32>
    %172 = vector.extract_strided_slice %155 {offsets = [0, 56], sizes = [16, 8], strides = [1, 1]} : vector<16x96xf32> to vector<16x8xf32>
    %173 = vector.shape_cast %172 : vector<16x8xf32> to vector<2x8x8xf32>
    %174 = tpu.concatenate %167, %169, %171, %173 in 0 : vector<2x8x8xf32>, vector<2x8x8xf32>, vector<2x8x8xf32>, vector<2x8x8xf32> -> vector<8x8x8xf32>
    %175 = arith.truncf %174 : vector<8x8x8xf32> to vector<8x8x8xbf16>
    %176 = vector.extract_strided_slice %155 {offsets = [0, 64], sizes = [16, 8], strides = [1, 1]} : vector<16x96xf32> to vector<16x8xf32>
    %177 = vector.shape_cast %176 : vector<16x8xf32> to vector<2x8x8xf32>
    %178 = vector.extract_strided_slice %155 {offsets = [0, 72], sizes = [16, 8], strides = [1, 1]} : vector<16x96xf32> to vector<16x8xf32>
    %179 = vector.shape_cast %178 : vector<16x8xf32> to vector<2x8x8xf32>
    %180 = vector.extract_strided_slice %155 {offsets = [0, 80], sizes = [16, 8], strides = [1, 1]} : vector<16x96xf32> to vector<16x8xf32>
    %181 = vector.shape_cast %180 : vector<16x8xf32> to vector<2x8x8xf32>
    %182 = vector.extract_strided_slice %155 {offsets = [0, 88], sizes = [16, 8], strides = [1, 1]} : vector<16x96xf32> to vector<16x8xf32>
    %183 = vector.shape_cast %182 : vector<16x8xf32> to vector<2x8x8xf32>
    %184 = tpu.concatenate %177, %179, %181, %183 in 0 : vector<2x8x8xf32>, vector<2x8x8xf32>, vector<2x8x8xf32>, vector<2x8x8xf32> -> vector<8x8x8xf32>
    %185 = arith.truncf %184 : vector<8x8x8xf32> to vector<8x8x8xbf16>
    "tpu.trace_start"() <{level = 10 : i32, message = "gqd,gkd->gqk"}> : () -> ()
    %cst_81 = arith.constant dense<0.000000e+00> : vector<8x8x8xf32>
    %186 = tpu.matmul %165, %175, %cst_81 {dimension_numbers = #tpu.dot_dimension_numbers<[2], [2], [1], [1], [0, 0, 0, 1, 1, 1], [0], [0]>} : vector<8x8x8xbf16>, vector<8x8x8xbf16>, vector<8x8x8xf32> -> vector<8x8x8xf32>
    "tpu.trace_stop"() : () -> ()
    %cst_82 = arith.constant dense<0xFF800000> : vector<8x8xf32>
    %187 = vector.multi_reduction <maximumf>, %186, %cst_82 [2] : vector<8x8x8xf32> to vector<8x8xf32>
    %188 = vector.shape_cast %187 : vector<8x8xf32> to vector<8x8x1xf32>
    %189 = vector.broadcast %188 : vector<8x8x1xf32> to vector<8x8x8xf32>
    %190 = arith.subf %186, %189 : vector<8x8x8xf32>
    %191 = math.exp %190 : vector<8x8x8xf32>
    %cst_83 = arith.constant dense<0.000000e+00> : vector<8x8xf32>
    %192 = vector.multi_reduction <add>, %191, %cst_83 [2] : vector<8x8x8xf32> to vector<8x8xf32>
    %193 = vector.shape_cast %192 : vector<8x8xf32> to vector<8x8x1xf32>
    %194 = tpu.reciprocal %193 {approx = true} : vector<8x8x1xf32> -> vector<8x8x1xf32>
    %195 = vector.broadcast %194 : vector<8x8x1xf32> to vector<8x8x8xf32>
    %196 = arith.mulf %191, %195 : vector<8x8x8xf32>
    %197 = arith.truncf %196 : vector<8x8x8xf32> to vector<8x8x8xbf16>
    "tpu.trace_start"() <{level = 10 : i32, message = "gqk,gkd->gqd"}> : () -> ()
    %cst_84 = arith.constant dense<0.000000e+00> : vector<8x8x8xf32>
    %198 = tpu.matmul %197, %185, %cst_84 {dimension_numbers = #tpu.dot_dimension_numbers<[2], [1], [1], [2], [0, 0, 0, 1, 1, 2], [0], [0]>} : vector<8x8x8xbf16>, vector<8x8x8xbf16>, vector<8x8x8xf32> -> vector<8x8x8xf32>
    "tpu.trace_stop"() : () -> ()
    %199 = vector.extract_strided_slice %198 {offsets = [0, 0, 0], sizes = [2, 8, 8], strides = [1, 1, 1]} : vector<8x8x8xf32> to vector<2x8x8xf32>
    %200 = vector.extract_strided_slice %198 {offsets = [2, 0, 0], sizes = [2, 8, 8], strides = [1, 1, 1]} : vector<8x8x8xf32> to vector<2x8x8xf32>
    %201 = vector.extract_strided_slice %198 {offsets = [4, 0, 0], sizes = [2, 8, 8], strides = [1, 1, 1]} : vector<8x8x8xf32> to vector<2x8x8xf32>
    %202 = vector.extract_strided_slice %198 {offsets = [6, 0, 0], sizes = [2, 8, 8], strides = [1, 1, 1]} : vector<8x8x8xf32> to vector<2x8x8xf32>
    %203 = tpu.concatenate %199, %200, %201, %202 in 2 : vector<2x8x8xf32>, vector<2x8x8xf32>, vector<2x8x8xf32>, vector<2x8x8xf32> -> vector<2x8x32xf32>
    %204 = vector.shape_cast %203 : vector<2x8x32xf32> to vector<16x32xf32>
    %205 = arith.truncf %204 : vector<16x32xf32> to vector<16x32xbf16>
    %cst_85 = arith.constant dense<0.000000e+00> : vector<16x32xf32>
    %206 = tpu.matmul %205, %137, %cst_85 {dimension_numbers = #tpu.dot_dimension_numbers<[1], [0], [0], [1], [0, 0, 1, 1], [], []>} : vector<16x32xbf16>, vector<32x32xbf16>, vector<16x32xf32> -> vector<16x32xf32>
    %207 = arith.addf %133, %206 : vector<16x32xf32>
    %cst_86 = arith.constant dense<0.000000e+00> : vector<32xf32>
    %208 = vector.multi_reduction <add>, %207, %cst_86 [0] : vector<16x32xf32> to vector<32xf32>
    %209 = vector.shape_cast %208 : vector<32xf32> to vector<1x32xf32>
    %cst_87 = arith.constant 1.600000e+01 : f32
    %210 = vector.broadcast %cst_87 : f32 to vector<1x32xf32>
    %211 = arith.divf %209, %210 : vector<1x32xf32>
    %212 = arith.mulf %207, %207 : vector<16x32xf32>
    %cst_88 = arith.constant dense<0.000000e+00> : vector<32xf32>
    %213 = vector.multi_reduction <add>, %212, %cst_88 [0] : vector<16x32xf32> to vector<32xf32>
    %214 = vector.shape_cast %213 : vector<32xf32> to vector<1x32xf32>
    %cst_89 = arith.constant 1.600000e+01 : f32
    %215 = vector.broadcast %cst_89 : f32 to vector<1x32xf32>
    %216 = arith.divf %214, %215 : vector<1x32xf32>
    %217 = arith.mulf %211, %211 : vector<1x32xf32>
    %218 = arith.subf %216, %217 : vector<1x32xf32>
    %cst_90 = arith.constant 0.000000e+00 : f32
    %219 = vector.broadcast %cst_90 : f32 to vector<1x32xf32>
    %220 = arith.maximumf %218, %219 : vector<1x32xf32>
    %221 = vector.broadcast %211 : vector<1x32xf32> to vector<16x32xf32>
    %222 = arith.subf %207, %221 : vector<16x32xf32>
    %cst_91 = arith.constant 9.99999974E-6 : f32
    %223 = vector.broadcast %cst_91 : f32 to vector<1x32xf32>
    %224 = arith.addf %220, %223 : vector<1x32xf32>
    %225 = math.rsqrt %224 : vector<1x32xf32>
    %226 = vector.broadcast %225 : vector<1x32xf32> to vector<16x32xf32>
    %227 = arith.mulf %222, %226 : vector<16x32xf32>
    %228 = vector.broadcast %147 : vector<1x32xf32> to vector<16x32xf32>
    %229 = arith.mulf %227, %228 : vector<16x32xf32>
    %230 = vector.broadcast %149 : vector<1x32xf32> to vector<16x32xf32>
    %231 = arith.addf %229, %230 : vector<16x32xf32>
    %232 = arith.truncf %231 : vector<16x32xf32> to vector<16x32xbf16>
    %cst_92 = arith.constant dense<0.000000e+00> : vector<16x64xf32>
    %233 = tpu.matmul %232, %139, %cst_92 {dimension_numbers = #tpu.dot_dimension_numbers<[1], [0], [0], [1], [0, 0, 1, 1], [], []>} : vector<16x32xbf16>, vector<32x64xbf16>, vector<16x64xf32> -> vector<16x64xf32>
    %234 = vector.broadcast %143 : vector<1x64xf32> to vector<16x64xf32>
    %235 = arith.addf %233, %234 : vector<16x64xf32>
    %cst_93 = arith.constant 0.000000e+00 : f32
    %236 = vector.broadcast %cst_93 : f32 to vector<16x64xf32>
    %237 = arith.maximumf %235, %236 : vector<16x64xf32>
    %238 = arith.truncf %237 : vector<16x64xf32> to vector<16x64xbf16>
    %cst_94 = arith.constant dense<0.000000e+00> : vector<16x32xf32>
    %239 = tpu.matmul %238, %141, %cst_94 {dimension_numbers = #tpu.dot_dimension_numbers<[1], [0], [0], [1], [0, 0, 1, 1], [], []>} : vector<16x64xbf16>, vector<64x32xbf16>, vector<16x32xf32> -> vector<16x32xf32>
    %240 = vector.broadcast %145 : vector<1x32xf32> to vector<16x32xf32>
    %241 = arith.addf %239, %240 : vector<16x32xf32>
    %242 = arith.addf %231, %241 : vector<16x32xf32>
    %cst_95 = arith.constant dense<0.000000e+00> : vector<32xf32>
    %243 = vector.multi_reduction <add>, %242, %cst_95 [0] : vector<16x32xf32> to vector<32xf32>
    %244 = vector.shape_cast %243 : vector<32xf32> to vector<1x32xf32>
    %cst_96 = arith.constant 1.600000e+01 : f32
    %245 = vector.broadcast %cst_96 : f32 to vector<1x32xf32>
    %246 = arith.divf %244, %245 : vector<1x32xf32>
    %247 = arith.mulf %242, %242 : vector<16x32xf32>
    %cst_97 = arith.constant dense<0.000000e+00> : vector<32xf32>
    %248 = vector.multi_reduction <add>, %247, %cst_97 [0] : vector<16x32xf32> to vector<32xf32>
    %249 = vector.shape_cast %248 : vector<32xf32> to vector<1x32xf32>
    %cst_98 = arith.constant 1.600000e+01 : f32
    %250 = vector.broadcast %cst_98 : f32 to vector<1x32xf32>
    %251 = arith.divf %249, %250 : vector<1x32xf32>
    %252 = arith.mulf %246, %246 : vector<1x32xf32>
    %253 = arith.subf %251, %252 : vector<1x32xf32>
    %cst_99 = arith.constant 0.000000e+00 : f32
    %254 = vector.broadcast %cst_99 : f32 to vector<1x32xf32>
    %255 = arith.maximumf %253, %254 : vector<1x32xf32>
    %256 = vector.broadcast %246 : vector<1x32xf32> to vector<16x32xf32>
    %257 = arith.subf %242, %256 : vector<16x32xf32>
    %cst_100 = arith.constant 9.99999974E-6 : f32
    %258 = vector.broadcast %cst_100 : f32 to vector<1x32xf32>
    %259 = arith.addf %255, %258 : vector<1x32xf32>
    %260 = math.rsqrt %259 : vector<1x32xf32>
    %261 = vector.broadcast %260 : vector<1x32xf32> to vector<16x32xf32>
    %262 = arith.mulf %257, %261 : vector<16x32xf32>
    %263 = vector.broadcast %151 : vector<1x32xf32> to vector<16x32xf32>
    %264 = arith.mulf %262, %263 : vector<16x32xf32>
    %265 = vector.broadcast %153 : vector<1x32xf32> to vector<16x32xf32>
    %266 = arith.addf %264, %265 : vector<16x32xf32>
    %c0_101 = arith.constant 0 : index
    %c0_102 = arith.constant 0 : index
    %267 = vector.load %arg11[%c0_101, %c0_102] : memref<16x32xf32, #tpu.memory_space<vmem>>, vector<16x32xf32>
    tpu.vector_store %arg11[%c0_101, %c0_102], %266 {strides = array<i32>} : memref<16x32xf32, #tpu.memory_space<vmem>>, vector<16x32xf32>,
    return
  }
}

</mosaic_0001>

<bundles_post_ra>
// kernel: tpu_custom_call.1
= control target key start
LH: loop header
LB: loop body
LE: loop exit
PB: predicated region body
PF: predicated region fallthrough
CT: control target
= control target key end

     0   :  { %16 = vsyncpa [#allocation3], 0  ;;  %s4024_s0 = inlined_call_operand.hbm [shape: f32[16,32], index: 0, kind: input, shape index: {}]   ;;  %s4025_s1 = inlined_call_operand.vmem [shape: bf16[2,32,96], index: 1, kind: input, shape index: {}]   ;;  %s4026_s2 = inlined_call_operand.vmem [shape: bf16[2,32,32], index: 2, kind: input, shape index: {}]   ;;  %s4027_s3 = inlined_call_operand.vmem [shape: f32[2,1,32], index: 3, kind: input, shape index: {}]   ;;  %s4028_s4 = inlined_call_operand.vmem [shape: f32[2,1,32], index: 4, kind: input, shape index: {}]   ;;  %s4029_s5 = inlined_call_operand.vmem [shape: bf16[2,32,64], index: 5, kind: input, shape index: {}]   ;;  %s4030_s6 = inlined_call_operand.vmem [shape: f32[2,1,64], index: 6, kind: input, shape index: {}]   ;;  %s4031_s7 = inlined_call_operand.vmem [shape: bf16[2,64,32], index: 7, kind: input, shape index: {}]   ;;  %s4032_s8 = inlined_call_operand.vmem [shape: f32[2,1,32], index: 8, kind: input, shape index: {}]   ;;  %s4033_s9 = inlined_call_operand.vmem [shape: f32[2,1,32], index: 9, kind: input, shape index: {}]   ;;  %s4034_s10 = inlined_call_operand.vmem [shape: f32[2,1,32], index: 10, kind: input, shape index: {}]   ;;  %s4035_s11 = inlined_call_operand.hbm [shape: f32[16,32], index: 11, kind: output, shape index: {}]  }
   0x1   :  { %17 = vsyncpa [#allocation4], 0  ;;  %s3375_s17 = smov [#allocation2]   ;;  %s3327_s21 = scalar_lea.hbm %s4024_s0, 256 }
   0x2   :  { %s23_s18 = sshll.u32 %s3375_s17, 4  ;;  %p3328_p0 = scmp.ne.s32.totalorder %s4024_s0, %s3327_s21  ;;  %s24_s18 = int_to_ptr.vmem [resolvable:$true] %s23_s18 }
   0x3   :  { %p3331_p1 = scmp.lt.u32.totalorder %s3327_s21, %s4024_s0 }
   0x5   :  { %p3333_p2 = pnand %p3331_p1, %p3328_p0 }
   0x7   :  { %3336 = shalt.err (!%p3333_p2)
}
   0x8   :  { %s3337_s26 = scalar_lea.vmem %s24_s18, 256  ;;  %p3342_p4 = scmp.lt.s32.totalorder %s24_s18, %s24_s18 }
   0x9   :  { %p3338_p3 = scmp.ne.s32.totalorder %s24_s18, %s3337_s26  ;;  %p3343_p5 = scmp.lt.s32.totalorder %s3337_s26, %s3337_s26 }
   0xb   :  { %p3344_p6 = por %p3343_p5, %p3342_p4 }
   0xd   :  { %p3345_p7 = pnand %p3344_p6, %p3338_p3 }
   0xf   :  { %3348 = shalt.err (!%p3345_p7)
}
  0x10   :  { %s3376_s27 = smov 128   ;;  %s3377_s28 = smov 8  }
  0x11   :  { %29 = dma.hbm_to_vmem [thread:$0]  %s4024_s0, 256, %s24_s18, [#allocation3], %s3376_s27, %s3376_s27, %s3377_s28  }
  0x12   :  { %3371 = dma.done.wait [#allocation3], 256  }
  0x13   :  { %3372 = vsyncadd [#allocation3], 4294967040  ;;  %v3378_v0 = vmov 0.0   ;;  %vm3379_vm0 = vmmov 0   ;;  %v3235_v1 = vld [vmem:[%s4025_s1] sm:$0xff]   ;;  %v3236_v2 = vld [vmem:[%s4025_s1 + $0x8] sm:$0xff]  }
  0x14   :  { %2898 = vmatprep.subr.bf16.mxu1 %v3378_v0  ;;  %2902 = vmatprep.mubr.msk.bf16.mxu1 %vm3379_vm0, %v3378_v0  ;;  %v3475_v3 = vld [vmem:[#allocation2] sm:$0xff]  ;;  %v3477_v4 = vld [vmem:[#allocation2 + $0x8] sm:$0xff]  ;;  %vm95_vm1 = vcmask 261120   ;;  %s3380_s15 = smov 104   ;;  %s3381_s16 = smov 120   ;;  %vm171_vm2 = vcmask 64512  }
  0x15   :  { %2912 = vmatprep.subr.bf16.mxu0 %v3378_v0  ;;  %2914 = vmatprep.mubr.msk.bf16.mxu0 %vm3379_vm0, %v3378_v0  ;;  %v82_v5 = vpack.c.bf16 %v3477_v4, %v3475_v3  ;;  %s3382_s17 = smov 96   ;;  %s3383_s18 = smov 112   ;;  %vm662_vm3 = vcmask 1043456   ;;  %vm1068_vm4 = vcmask 130048   ;;  %vm1071_vm5 = vcmask 195584  }
  0x16   :  { %2899 = vmatpush3.bf16.msra.mxu1 %v3235_v1  ;;  %s3384_s19 = smov 64   ;;  %s3385_s24 = smov 16   ;;  %vm1277_vm6 = vcmask 523264  }
  0x17   :  { %2900 = vmatprep.subr.bf16.mxu1 %v3378_v0  ;;  %s3386_s25 = smov 24  }
  0x1a   :  { %2901 = vmatpush3.bf16.msra.mxu1 %v3236_v2 }
  0x1b   :  { %2906 = vmatprep.subr.bf16.mxu1 %v3378_v0 }
  0x1d   :  { %2903 = vmatmul.mubr.msk.bf16.vlgmr.msra.gmra.mrb[0].mxu1 %vm95_vm1, %v82_v5 }
  0x1e   :  { %2908 = vmatprep.mubr.msk.bf16.mxu1 %vm3379_vm0, %v3378_v0 }
  0xf0   :  { %v133_v6 = vpop.f32.mrb[0].mxu1 }
  0xf1   :  { %v2904_v7 = vpop.f32.mrb[1].mxu1  ;;  %v160_v11 = vpack.c.bf16 %v133_v6, %v133_v6 }
  0xf2   :  { %v136_v8 = vpop.f32.mrb[2].mxu1 }
  0xf3   :  { %v2905_v9 = vpop.f32.mrb[3].mxu1  ;;  %v3185_v10 = vpack.i.bf16 %v136_v8, %v133_v6  ;;  %v161_v12 = vpack.c.bf16 %v136_v8, %v136_v8 }
  0xf5   :  { %3186 = vrot.lane.b32.xlu1 %v3185_v10, %s3380_s15  ;;  %3176 = vrot.lane.b32.xlu0 %v3185_v10, %s3381_s16 }
  0xf9   :  { %169 = vrot.lane.b32.xlu1 %v160_v11, %s3382_s17  ;;  %3181 = vrot.lane.b32.xlu0 %v3185_v10, %s3383_s18 }
  0xfd   :  { %219 = vrot.lane.b32.xlu0 %v161_v12, %s3382_s17 }
 0x167   :  { %v3187_v13 = vpop.permute.xlu1 %3186  ;;  %v3177_v14 = vpop.permute.xlu0 %3176 }
 0x168   :  { %v3179_v15 = vunpack.i.h.bf16 %v3177_v14  ;;  %v3178_v16 = vunpack.i.l.bf16 %v3177_v14  ;;  %v3188_v24 = vunpack.i.l.bf16 %v3187_v13  ;;  %v3189_v27 = vunpack.i.h.bf16 %v3187_v13 }
 0x16a   :  { %v3491_v17 = vpack.c.bf16 %v3179_v15, %v3179_v15  ;;  %v3493_v18 = vpack.c.bf16 %v3178_v16, %v3178_v16  ;;  %v3510_v30 = vpack.c.bf16 %v3188_v24, %v3188_v24  ;;  %v3513_v31 = vpack.c.bf16 %v3189_v27, %v3189_v27 }
 0x16b   :  { %v170_v19 = vpop.permute.xlu1 %169  ;;  %v3182_v20 = vpop.permute.xlu0 %3181 }
 0x16c   :  { %v176_v21 = vsel %vm171_vm2, %v170_v19, 0  ;;  %v3184_v22 = vunpack.i.h.bf16 %v3182_v20  ;;  %v3183_v23 = vunpack.i.l.bf16 %v3182_v20  ;;  %268 = vrot.lane.b32.xlu1 %v3493_v18, %s3382_s17  ;;  %317 = vrot.lane.b32.xlu0 %v3491_v17, %s3382_s17 }
 0x16d   :  { %2907 = vmatpush3.bf16.xpose.msra.mxu1 %v176_v21 }
 0x16e   :  { %v3500_v25 = vpack.c.bf16 %v3184_v22, %v3184_v22  ;;  %v3502_v26 = vpack.c.bf16 %v3183_v23, %v3183_v23  ;;  %2918 = vmatprep.subr.bf16.mxu1 %v3378_v0 }
 0x16f   :  { %v220_v28 = vpop.permute.xlu0 %219 }
 0x170   :  { %366 = vrot.lane.b32.xlu1 %v3502_v26, %s3382_s17  ;;  %415 = vrot.lane.b32.xlu0 %v3500_v25, %s3382_s17  ;;  %v225_v29 = vsel %vm171_vm2, %v220_v28, 0 }
 0x171   :  { %2913 = vmatpush3.bf16.xpose.msra.mxu0 %v225_v29 }
 0x172   :  { %2924 = vmatprep.subr.bf16.mxu0 %v3378_v0 }
 0x174   :  { %2909 = vmatmul.mubr.msk.bf16.vlgmr.msra.gmra.mrb[4].mxu1 %vm171_vm2, %v160_v11  ;;  %464 = vrot.lane.b32.xlu1 %v3510_v30, %s3382_s17 }
 0x175   :  { %513 = vrot.lane.b32.xlu0 %v3513_v31, %s3382_s17  ;;  %2920 = vmatprep.mubr.msk.bf16.mxu1 %vm3379_vm0, %v3378_v0 }
 0x178   :  { %706 = vrot.lane.b32.xlu1 %v161_v12, %s3384_s19  ;;  %2915 = vmatmul.mubr.msk.bf16.vlgmr.msra.gmra.mrb[0].mxu0 %vm171_vm2, %v161_v12 }
 0x179   :  { %657 = vrot.lane.b32.xlu0 %v160_v11, %s3384_s19  ;;  %2926 = vmatprep.mubr.msk.bf16.mxu0 %vm3379_vm0, %v3378_v0 }
 0x1de   :  { %v269_v32 = vpop.permute.xlu1 %268  ;;  %v318_v33 = vpop.permute.xlu0 %317 }
 0x1df   :  { %v274_v34 = vsel %vm171_vm2, %v269_v32, 0  ;;  %v323_v35 = vsel %vm171_vm2, %v318_v33, 0 }
 0x1e0   :  { %2919 = vmatpush3.bf16.xpose.msra.mxu1 %v274_v34  ;;  %2925 = vmatpush3.bf16.xpose.msra.mxu0 %v323_v35 }
 0x1e1   :  { %2930 = vmatprep.subr.bf16.mxu1 %v3378_v0  ;;  %2936 = vmatprep.subr.bf16.mxu0 %v3378_v0 }
 0x1e2   :  { %v367_v36 = vpop.permute.xlu1 %366  ;;  %v416_v37 = vpop.permute.xlu0 %415 }
 0x1e3   :  { %v372_v38 = vsel %vm171_vm2, %v367_v36, 0  ;;  %v421_v39 = vsel %vm171_vm2, %v416_v37, 0 }
 0x1e6   :  { %v465_v40 = vpop.permute.xlu1 %464 }
 0x1e7   :  { %2921 = vmatmul.mubr.msk.bf16.vlgmr.msra.gmra.mrb[8].mxu1 %vm171_vm2, %v3493_v18  ;;  %2927 = vmatmul.mubr.msk.bf16.vlgmr.msra.gmra.mrb[4].mxu0 %vm171_vm2, %v3491_v17  ;;  %v514_v41 = vpop.permute.xlu0 %513  ;;  %v470_v42 = vsel %vm171_vm2, %v465_v40, 0 }
 0x1e8   :  { %2931 = vmatpush3.bf16.xpose.msra.mxu1 %v372_v38  ;;  %2937 = vmatpush3.bf16.xpose.msra.mxu0 %v421_v39  ;;  %v519_v43 = vsel %vm171_vm2, %v514_v41, 0 }
 0x1e9   :  { %2932 = vmatprep.mubr.msk.bf16.mxu1 %vm3379_vm0, %v3378_v0  ;;  %2938 = vmatprep.mubr.msk.bf16.mxu0 %vm3379_vm0, %v3378_v0 }
 0x1ea   :  { %2942 = vmatprep.subr.bf16.mxu1 %v3378_v0  ;;  %2948 = vmatprep.subr.bf16.mxu0 %v3378_v0  ;;  %v707_v44 = vpop.permute.xlu1 %706 }
 0x1eb   :  { %v658_v45 = vpop.permute.xlu0 %657  ;;  %v712_v46 = vsel %vm662_vm3, %v707_v44, 0 }
 0x1ec   :  { %v664_v47 = vsel %vm662_vm3, %v658_v45, 0 }
 0x1ef   :  { %2933 = vmatmul.mubr.msk.bf16.vlgmr.msra.gmra.mrb[12].mxu1 %vm171_vm2, %v3502_v26  ;;  %2939 = vmatmul.mubr.msk.bf16.vlgmr.msra.gmra.mrb[8].mxu0 %vm171_vm2, %v3500_v25 }
 0x1f0   :  { %2943 = vmatpush3.bf16.xpose.msra.mxu1 %v470_v42  ;;  %2949 = vmatpush3.bf16.xpose.msra.mxu0 %v519_v43 }
 0x1f1   :  { %2944 = vmatprep.mubr.msk.bf16.mxu1 %vm3379_vm0, %v3378_v0  ;;  %2950 = vmatprep.mubr.msk.bf16.mxu0 %vm3379_vm0, %v3378_v0 }
 0x1f2   :  { %2954 = vmatprep.subr.bf16.mxu1 %v3378_v0  ;;  %2960 = vmatprep.subr.bf16.mxu0 %v3378_v0 }
 0x1f7   :  { %2945 = vmatmul.mubr.msk.bf16.vlgmr.msra.gmra.mrb[16].mxu1 %vm171_vm2, %v3510_v30  ;;  %2951 = vmatmul.mubr.msk.bf16.vlgmr.msra.gmra.mrb[12].mxu0 %vm171_vm2, %v3513_v31 }
 0x1f8   :  { %2955 = vmatpush3.bf16.msra.mxu1 %v664_v47  ;;  %2961 = vmatpush3.bf16.msra.mxu0 %v712_v46 }
 0x1f9   :  { %2956 = vmatprep.mubr.msk.bf16.mxu1 %vm3379_vm0, %v3378_v0  ;;  %2962 = vmatprep.mubr.msk.bf16.mxu0 %vm3379_vm0, %v3378_v0 }
 0x1fa   :  { %2966 = vmatprep.subr.bf16.mxu1 %v3378_v0  ;;  %2972 = vmatprep.subr.bf16.mxu0 %v3378_v0 }
 0x247   :  { %v212_v48 = vpop.f32.mrb[4].mxu1 }
 0x248   :  { %v2910_v49 = vpop.f32.mrb[5].mxu1  ;;  %v561_v50 = vsel %vm171_vm2, %v212_v48, -inf }
 0x249   :  { %562 = vmax.xlane.f32.xlu1 %v561_v50  ;;  %v215_v51 = vpop.f32.mrb[6].mxu1 }
 0x24a   :  { %v2911_v52 = vpop.f32.mrb[7].mxu1 }
 0x24b   :  { %v261_v53 = vpop.f32.mrb[0].mxu0 }
 0x24c   :  { %v2916_v54 = vpop.f32.mrb[1].mxu0  ;;  %v564_v55 = vsel %vm171_vm2, %v261_v53, -inf }
 0x24d   :  { %565 = vmax.xlane.f32.xlu0 %v564_v55  ;;  %v264_v56 = vpop.f32.mrb[2].mxu0 }
 0x24e   :  { %v2917_v57 = vpop.f32.mrb[3].mxu0 }
 0x2ba   :  { %v310_v58 = vpop.f32.mrb[8].mxu1  ;;  %v359_v59 = vpop.f32.mrb[4].mxu0 }
 0x2bb   :  { %v2922_v60 = vpop.f32.mrb[9].mxu1  ;;  %v2928_v61 = vpop.f32.mrb[5].mxu0  ;;  %v570_v62 = vsel %vm171_vm2, %v359_v59, -inf  ;;  %v567_v63 = vsel %vm171_vm2, %v310_v58, -inf }
 0x2bc   :  { %v362_v1 = vpop.f32.mrb[6].mxu0  ;;  %571 = vmax.xlane.f32.xlu1 %v570_v62  ;;  %568 = vmax.xlane.f32.xlu0 %v567_v63  ;;  %v313_v2 = vpop.f32.mrb[10].mxu1 }
 0x2bd   :  { %v2923_v5 = vpop.f32.mrb[11].mxu1  ;;  %v2929_v6 = vpop.f32.mrb[7].mxu0 }
 0x2c2   :  { %v3571_v7 = vpop.f32.mrb[12].mxu1  ;;  %v457_v8 = vpop.f32.mrb[8].mxu0 }
 0x2c3   :  { %v2934_v9 = vpop.f32.mrb[13].mxu1  ;;  %v2940_v10 = vpop.f32.mrb[9].mxu0  ;;  %v576_v11 = vsel %vm171_vm2, %v457_v8, -inf  ;;  %v573_v12 = vsel %vm171_vm2, %v3571_v7, -inf }
 0x2c4   :  { %v460_v13 = vpop.f32.mrb[10].mxu0  ;;  %577 = vmax.xlane.f32.xlu1 %v576_v11  ;;  %574 = vmax.xlane.f32.xlu0 %v573_v12  ;;  %v411_v14 = vpop.f32.mrb[14].mxu1 }
 0x2c5   :  { %v2935_v15 = vpop.f32.mrb[15].mxu1  ;;  %v2941_v16 = vpop.f32.mrb[11].mxu0 }
 0x2ca   :  { %v3576_v19 = vpop.f32.mrb[16].mxu1  ;;  %v555_v20 = vpop.f32.mrb[12].mxu0 }
 0x2cb   :  { %v2946_v21 = vpop.f32.mrb[17].mxu1  ;;  %v2952_v22 = vpop.f32.mrb[13].mxu0  ;;  %v582_v23 = vsel %vm171_vm2, %v555_v20, -inf  ;;  %v579_v24 = vsel %vm171_vm2, %v3576_v19, -inf }
 0x2cc   :  { %v558_v27 = vpop.f32.mrb[14].mxu0  ;;  %583 = vmax.xlane.f32.xlu1 %v582_v23  ;;  %580 = vmax.xlane.f32.xlu0 %v579_v24  ;;  %v509_v28 = vpop.f32.mrb[18].mxu1 }
 0x2cd   :  { %v2947_v29 = vpop.f32.mrb[19].mxu1  ;;  %v2953_v32 = vpop.f32.mrb[15].mxu0 }
 0x2d6   :  { %v563_v33 = vpop.xlane.xlu1 %562 }
 0x2d7   :  { %v585_v35 = vsub.f32 %v212_v48, %v563_v33 }
 0x2d9   :  { %v593_v37 = vmul.f32 1.442695, %v585_v35 }
 0x2da   :  { %v566_v34 = vpop.xlane.xlu0 %565 }
 0x2db   :  { %v586_v36 = vsub.f32 %v261_v53, %v566_v34  ;;  %3255 = vpow2.f32 %v593_v37 }
 0x2dd   :  { %754 = vrot.lane.b32.xlu1 %v3493_v18, %s3384_s19  ;;  %v595_v38 = vmul.f32 1.442695, %v586_v36 }
 0x2df   :  { %3257 = vpow2.f32 %v595_v38 }
 0x2e2   :  { %802 = vrot.lane.b32.xlu0 %v3491_v17, %s3384_s19 }
 0x2e5   :  { %v3256_v39 = vpop.eup %3255 }
 0x2e6   :  { %v609_v42 = vsel %vm171_vm2, %v3256_v39, 0.0 }
 0x2e9   :  { %v3258_v40 = vpop.eup %3257 }
 0x2ea   :  { %v612_v41 = vsel %vm171_vm2, %v3258_v40, 0.0 }
 0x301   :  { %613 = vadd.xlane.f32.xlu1 %v612_v41  ;;  %610 = vadd.xlane.f32.xlu0 %v609_v42 }
 0x312   :  { %850 = vrot.lane.b32.xlu1 %v3502_v26, %s3384_s19 }
 0x349   :  { %v572_v17 = vpop.xlane.xlu1 %571  ;;  %v569_v18 = vpop.xlane.xlu0 %568 }
 0x34a   :  { %v588_v43 = vsub.f32 %v359_v59, %v572_v17  ;;  %v587_v44 = vsub.f32 %v310_v58, %v569_v18 }
 0x34c   :  { %v599_v45 = vmul.f32 1.442695, %v588_v43  ;;  %v597_v46 = vmul.f32 1.442695, %v587_v44 }
 0x34e   :  { %3259 = vpow2.f32 %v599_v45 }
 0x34f   :  { %3261 = vpow2.f32 %v597_v46 }
 0x351   :  { %v578_v47 = vpop.xlane.xlu1 %577  ;;  %v575_v60 = vpop.xlane.xlu0 %574 }
 0x352   :  { %v590_v48 = vsub.f32 %v457_v8, %v578_v47  ;;  %v589_v61 = vsub.f32 %v3571_v7, %v575_v60 }
 0x354   :  { %v603_v49 = vmul.f32 1.442695, %v590_v48  ;;  %v601_v63 = vmul.f32 1.442695, %v589_v61 }
 0x356   :  { %3263 = vpow2.f32 %v603_v49 }
 0x358   :  { %v3589_v50 = vpop.eup %3259 }
 0x359   :  { %v3591_v51 = vpop.eup %3261  ;;  %v584_v52 = vpop.xlane.xlu1 %583  ;;  %v618_v26 = vsel %vm171_vm2, %v3589_v50, 0.0 }
 0x35a   :  { %v592_v53 = vsub.f32 %v555_v20, %v584_v52  ;;  %619 = vadd.xlane.f32.xlu1 %v618_v26  ;;  %v615_v54 = vsel %vm171_vm2, %v3591_v51, 0.0  ;;  %v581_v62 = vpop.xlane.xlu0 %580 }
 0x35b   :  { %616 = vadd.xlane.f32.xlu0 %v615_v54  ;;  %v591_v1 = vsub.f32 %v3576_v19, %v581_v62 }
 0x35c   :  { %v607_v55 = vmul.f32 1.442695, %v592_v53 }
 0x35d   :  { %v605_v2 = vmul.f32 1.442695, %v591_v1  ;;  %v755_v5 = vpop.permute.xlu1 %754 }
 0x35e   :  { %3265 = vpow2.f32 %v607_v55  ;;  %v803_v6 = vpop.permute.xlu0 %802  ;;  %v760_v20 = vsel %vm662_vm3, %v755_v5, 0 }
 0x35f   :  { %3267 = vpow2.f32 %v601_v63  ;;  %v808_v19 = vsel %vm662_vm3, %v803_v6, 0 }
 0x360   :  { %v3597_v56 = vpop.eup %3263  ;;  %3269 = vpow2.f32 %v605_v2 }
 0x361   :  { %v624_v57 = vsel %vm171_vm2, %v3597_v56, 0.0 }
 0x362   :  { %625 = vadd.xlane.f32.xlu1 %v624_v57 }
 0x368   :  { %v3601_v58 = vpop.eup %3265 }
 0x369   :  { %v630_v59 = vsel %vm171_vm2, %v3601_v58, 0.0  ;;  %v3611_v8 = vpop.eup %3267 }
 0x36a   :  { %631 = vadd.xlane.f32.xlu1 %v630_v59  ;;  %v3615_v7 = vpop.eup %3269 }
 0x371   :  { %898 = vrot.lane.b32.xlu0 %v3500_v25, %s3384_s19  ;;  %v621_v25 = vsel %vm171_vm2, %v3611_v8, 0.0 }
 0x37b   :  { %946 = vrot.lane.b32.xlu1 %v3510_v30, %s3384_s19  ;;  %v627_v30 = vsel %vm171_vm2, %v3615_v7, 0.0 }
 0x38e   :  { %v614_v9 = vpop.xlane.xlu1 %613  ;;  %v611_v10 = vpop.xlane.xlu0 %610 }
 0x38f   :  { %3271 = vrcp.f32 %v614_v9 }
 0x390   :  { %3273 = vrcp.f32 %v611_v10  ;;  %622 = vadd.xlane.f32.xlu0 %v621_v25 }
 0x392   :  { %v851_v21 = vpop.permute.xlu1 %850 }
 0x394   :  { %628 = vadd.xlane.f32.xlu0 %v627_v30 }
 0x399   :  { %v3272_v11 = vpop.eup %3271 }
 0x39a   :  { %v3274_v12 = vpop.eup %3273  ;;  %v642_v13 = vmul.f32 %v3272_v11, %v3258_v40  ;;  %v3237_v11 = vld [vmem:[%s4026_s2] sm:$0xff]  }
 0x39b   :  { %v641_v14 = vmul.f32 %v3274_v12, %v3256_v39 }
 0x39c   :  { %v650_v15 = vpack.c.bf16 %v642_v13, %v642_v13 }
 0x39d   :  { %v649_v16 = vpack.c.bf16 %v641_v14, %v641_v14 }
 0x39e   :  { %2963 = vmatmul.mubr.msk.bf16.vlgmr.msra.gmra.mrb[16].mxu0 %vm171_vm2, %v650_v15  ;;  %v3238_v15 = vld [vmem:[%s4026_s2 + $0x8] sm:$0xff]  }
 0x39f   :  { %2957 = vmatmul.mubr.msk.bf16.vlgmr.msra.gmra.mrb[20].mxu1 %vm171_vm2, %v649_v16  ;;  %2973 = vmatpush3.bf16.msra.mxu0 %v808_v19 }
 0x3a0   :  { %2967 = vmatpush3.bf16.msra.mxu1 %v760_v20  ;;  %2968 = vmatprep.mubr.msk.bf16.mxu1 %vm3379_vm0, %v3378_v0 }
 0x3a1   :  { %2974 = vmatprep.mubr.msk.bf16.mxu0 %vm3379_vm0, %v3378_v0  ;;  %2978 = vmatprep.subr.bf16.mxu1 %v3378_v0 }
 0x3a2   :  { %2984 = vmatprep.subr.bf16.mxu0 %v3378_v0 }
 0x3aa   :  { %994 = vrot.lane.b32.xlu0 %v3513_v31, %s3384_s19  ;;  %v856_v31 = vsel %vm662_vm3, %v851_v21, 0 }
 0x3e7   :  { %v620_v22 = vpop.xlane.xlu1 %619 }
 0x3e8   :  { %3275 = vrcp.f32 %v620_v22  ;;  %v617_v23 = vpop.xlane.xlu0 %616 }
 0x3e9   :  { %3277 = vrcp.f32 %v617_v23 }
 0x3ec   :  { %v899_v33 = vpop.permute.xlu0 %898 }
 0x3ed   :  { %v904_v36 = vsel %vm662_vm3, %v899_v33, 0 }
 0x3ef   :  { %v626_v24 = vpop.xlane.xlu1 %625 }
 0x3f0   :  { %3279 = vrcp.f32 %v626_v24 }
 0x3f2   :  { %v3276_v27 = vpop.eup %3275 }
 0x3f3   :  { %v3278_v28 = vpop.eup %3277  ;;  %v644_v29 = vmul.f32 %v3276_v27, %v3589_v50 }
 0x3f4   :  { %v643_v32 = vmul.f32 %v3278_v28, %v3591_v51 }
 0x3f5   :  { %v652_v34 = vpack.c.bf16 %v644_v29, %v644_v29 }
 0x3f6   :  { %v651_v35 = vpack.c.bf16 %v643_v32, %v643_v32 }
 0x3f7   :  { %2975 = vmatmul.mubr.msk.bf16.vlgmr.msra.gmra.mrb[20].mxu0 %vm171_vm2, %v652_v34  ;;  %v632_v40 = vpop.xlane.xlu1 %631 }
 0x3f8   :  { %2969 = vmatmul.mubr.msk.bf16.vlgmr.msra.gmra.mrb[24].mxu1 %vm171_vm2, %v651_v35  ;;  %2985 = vmatpush3.bf16.msra.mxu0 %v904_v36  ;;  %3281 = vrcp.f32 %v632_v40 }
 0x3f9   :  { %2979 = vmatpush3.bf16.msra.mxu1 %v856_v31  ;;  %2986 = vmatprep.mubr.msk.bf16.mxu0 %vm3379_vm0, %v3378_v0 }
 0x3fa   :  { %v3280_v37 = vpop.eup %3279  ;;  %2996 = vmatprep.subr.bf16.mxu0 %v3378_v0  ;;  %2980 = vmatprep.mubr.msk.bf16.mxu1 %vm3379_vm0, %v3378_v0 }
 0x3fb   :  { %v646_v38 = vmul.f32 %v3280_v37, %v3597_v56  ;;  %2990 = vmatprep.subr.bf16.mxu1 %v3378_v0  ;;  %v947_v48 = vpop.permute.xlu1 %946 }
 0x3fc   :  { %v952_v51 = vsel %vm662_vm3, %v947_v48, 0  ;;  %v3241_v48 = vld [vmem:[%s4031_s7] sm:$0xff]  }
 0x3fd   :  { %v654_v39 = vpack.c.bf16 %v646_v38, %v646_v38 }
 0x3ff   :  { %2987 = vmatmul.mubr.msk.bf16.vlgmr.msra.gmra.mrb[24].mxu0 %vm171_vm2, %v654_v39 }
 0x400   :  { %2998 = vmatprep.mubr.msk.bf16.mxu0 %vm3379_vm0, %v3378_v0 }
 0x402   :  { %v3282_v42 = vpop.eup %3281 }
 0x403   :  { %v648_v18 = vmul.f32 %v3282_v42, %v3601_v58 }
 0x405   :  { %v656_v46 = vpack.c.bf16 %v648_v18, %v648_v18 }
 0x41d   :  { %v623_v41 = vpop.xlane.xlu0 %622 }
 0x41e   :  { %3283 = vrcp.f32 %v623_v41 }
 0x421   :  { %v629_v17 = vpop.xlane.xlu0 %628 }
 0x422   :  { %3285 = vrcp.f32 %v629_v17 }
 0x425   :  { %v995_v43 = vpop.permute.xlu0 %994 }
 0x426   :  { %v1000_v44 = vsel %vm662_vm3, %v995_v43, 0 }
 0x427   :  { %2997 = vmatpush3.bf16.msra.mxu0 %v1000_v44 }
 0x428   :  { %v3284_v45 = vpop.eup %3283  ;;  %3010 = vmatprep.subr.bf16.mxu0 %v3378_v0 }
 0x429   :  { %v645_v47 = vmul.f32 %v3284_v45, %v3611_v8 }
 0x42a   :  { %2999 = vmatmul.mubr.msk.bf16.vlgmr.msra.gmra.mrb[28].mxu0 %vm171_vm2, %v656_v46  ;;  %v3239_v46 = vld [vmem:[%s4029_s5] sm:$0xff]  }
 0x42b   :  { %v653_v49 = vpack.c.bf16 %v645_v47, %v645_v47  ;;  %3014 = vmatprep.mubr.msk.bf16.mxu0 %vm3379_vm0, %v3378_v0  ;;  %3011 = vmatpush3.bf16.msra.mxu0 %v3239_v46  ;;  %v3240_v47 = vld [vmem:[%s4029_s5 + $0x8] sm:$0xff]  }
 0x42c   :  { %v3286_v50 = vpop.eup %3285  ;;  %3012 = vmatprep.subr.bf16.mxu0 %v3378_v0 }
 0x42d   :  { %2981 = vmatmul.mubr.msk.bf16.vlgmr.msra.gmra.mrb[28].mxu1 %vm171_vm2, %v653_v49  ;;  %v647_v52 = vmul.f32 %v3286_v50, %v3615_v7  ;;  %v3242_v49 = vld [vmem:[%s4031_s7 + $0x8] sm:$0xff]  }
 0x42e   :  { %2991 = vmatpush3.bf16.msra.mxu1 %v952_v51  ;;  %2992 = vmatprep.mubr.msk.bf16.mxu1 %vm3379_vm0, %v3378_v0 }
 0x42f   :  { %3002 = vmatprep.subr.bf16.mxu1 %v3378_v0  ;;  %v655_v26 = vpack.c.bf16 %v647_v52, %v647_v52  ;;  %3013 = vmatpush3.bf16.msra.mxu0 %v3240_v47 }
 0x430   :  { %3030 = vmatprep.subr.bf16.mxu0 %v3378_v0 }
 0x435   :  { %2993 = vmatmul.mubr.msk.bf16.vlgmr.msra.gmra.mrb[32].mxu1 %vm171_vm2, %v655_v26 }
 0x436   :  { %3006 = vmatprep.mubr.msk.bf16.mxu1 %vm3379_vm0, %v3378_v0  ;;  %3003 = vmatpush3.bf16.msra.mxu1 %v3237_v11 }
 0x437   :  { %3004 = vmatprep.subr.bf16.mxu1 %v3378_v0 }
 0x43a   :  { %3005 = vmatpush3.bf16.msra.mxu1 %v3238_v15 }
 0x43b   :  { %3018 = vmatprep.subr.bf16.mxu1 %v3378_v0 }
 0x471   :  { %v748_v53 = vpop.f32.mrb[16].mxu0 }
 0x472   :  { %v700_v54 = vpop.f32.mrb[20].mxu1  ;;  %v2964_v55 = vpop.f32.mrb[17].mxu0 }
 0x473   :  { %v2958_v56 = vpop.f32.mrb[21].mxu1  ;;  %v751_v57 = vpop.f32.mrb[18].mxu0 }
 0x474   :  { %v703_v58 = vpop.f32.mrb[22].mxu1  ;;  %v2965_v59 = vpop.f32.mrb[19].mxu0 }
 0x475   :  { %v2959_v60 = vpop.f32.mrb[23].mxu1 }
 0x4ca   :  { %v844_v61 = vpop.f32.mrb[20].mxu0 }
 0x4cb   :  { %v796_v62 = vpop.f32.mrb[24].mxu1  ;;  %v2976_v63 = vpop.f32.mrb[21].mxu0 }
 0x4cc   :  { %v3190_v1 = vpack.i.bf16 %v844_v61, %v796_v62  ;;  %v2970_v2 = vpop.f32.mrb[25].mxu1  ;;  %v847_v5 = vpop.f32.mrb[22].mxu0 }
 0x4cd   :  { %v799_v6 = vpop.f32.mrb[26].mxu1  ;;  %v2977_v8 = vpop.f32.mrb[23].mxu0 }
 0x4ce   :  { %3191 = vrot.lane.b32.xlu1 %v3190_v1, %s3377_s28  ;;  %v2971_v9 = vpop.f32.mrb[27].mxu1 }
 0x4d2   :  { %v940_v10 = vpop.f32.mrb[24].mxu0 }
 0x4d3   :  { %v2988_v25 = vpop.f32.mrb[25].mxu0 }
 0x4d4   :  { %v943_v7 = vpop.f32.mrb[26].mxu0 }
 0x4d5   :  { %v2989_v30 = vpop.f32.mrb[27].mxu0 }
 0x4fd   :  { %v1036_v12 = vpop.f32.mrb[28].mxu0 }
 0x4fe   :  { %v3000_v13 = vpop.f32.mrb[29].mxu0 }
 0x4ff   :  { %v1039_v14 = vpop.f32.mrb[30].mxu0 }
 0x500   :  { %v892_v16 = vpop.f32.mrb[28].mxu1  ;;  %v3001_v19 = vpop.f32.mrb[31].mxu0 }
 0x501   :  { %v3195_v20 = vpack.i.bf16 %v940_v10, %v892_v16  ;;  %v2982_v21 = vpop.f32.mrb[29].mxu1 }
 0x502   :  { %v895_v22 = vpop.f32.mrb[30].mxu1  ;;  %v2730_v21 = vld [vmem:[%s4027_s3] ss:$0 sm:$0xff] }
 0x503   :  { %3196 = vrot.lane.b32.xlu0 %v3195_v20, %s3385_s24  ;;  %v2983_v23 = vpop.f32.mrb[31].mxu1 }
 0x508   :  { %v988_v24 = vpop.f32.mrb[32].mxu1 }
 0x509   :  { %v3200_v27 = vpack.i.bf16 %v1036_v12, %v988_v24  ;;  %v2994_v28 = vpop.f32.mrb[33].mxu1  ;;  %v2731_v24 = vld [vmem:[%s4028_s4] ss:$0 sm:$0xff] }
 0x50a   :  { %v991_v29 = vpop.f32.mrb[34].mxu1 }
 0x50b   :  { %3201 = vrot.lane.b32.xlu1 %v3200_v27, %s3386_s25  ;;  %v2995_v32 = vpop.f32.mrb[35].mxu1 }
 0x540   :  { %v3192_v33 = vpop.permute.xlu1 %3191 }
 0x541   :  { %v3194_v35 = vunpack.i.h.bf16 %v3192_v33  ;;  %v3193_v36 = vunpack.i.l.bf16 %v3192_v33 }
 0x543   :  { %v1067_v39 = vsel %vm171_vm2, %v748_v53, %v3194_v35  ;;  %v1066_v40 = vsel %vm171_vm2, %v700_v54, %v3193_v36  ;;  %v3244_v35 = vld [vmem:[%s4031_s7 + $0x18] sm:$0xff]   ;;  %v2732_v36 = vld [vmem:[%s4030_s6] ss:$0 sm:$0xff] }
 0x575   :  { %v3197_v34 = vpop.permute.xlu0 %3196 }
 0x576   :  { %v3199_v31 = vunpack.i.h.bf16 %v3197_v34  ;;  %v3198_v37 = vunpack.i.l.bf16 %v3197_v34  ;;  %v3243_v34 = vld [vmem:[%s4031_s7 + $0x10] sm:$0xff]  }
 0x578   :  { %v1070_v17 = vsel %vm1068_vm4, %v1067_v39, %v3199_v31  ;;  %v1069_v18 = vsel %vm1068_vm4, %v1066_v40, %v3198_v37 }
 0x57d   :  { %v3202_v38 = vpop.permute.xlu1 %3201 }
 0x57e   :  { %v3204_v41 = vunpack.i.h.bf16 %v3202_v38  ;;  %v3203_v42 = vunpack.i.l.bf16 %v3202_v38 }
 0x580   :  { %v1073_v43 = vsel %vm1071_vm5, %v1070_v17, %v3204_v41  ;;  %v1072_v44 = vsel %vm1071_vm5, %v1069_v18, %v3203_v42 }
 0x581   :  { %v1074_v45 = vpack.c.bf16 %v1073_v43, %v1072_v44  ;;  %v3245_v43 = vld [vmem:[%s4025_s1 + $0x10] sm:$0xff]   ;;  %v3246_v44 = vld [vmem:[%s4025_s1 + $0x18] sm:$0xff]  }
 0x583   :  { %3007 = vmatmul.mubr.msk.bf16.vlgmr.msra.gmra.mrb[36].mxu1 %vm95_vm1, %v1074_v45  ;;  %v2736_v45 = vld [vmem:[%s4032_s8] ss:$0 sm:$0xff] }
 0x584   :  { %3026 = vmatprep.mubr.msk.bf16.mxu1 %vm3379_vm0, %v3378_v0  ;;  %3019 = vmatpush3.bf16.msra.mxu1 %v3241_v48 }
 0x585   :  { %3020 = vmatprep.subr.bf16.mxu1 %v3378_v0 }
 0x588   :  { %3021 = vmatpush3.bf16.msra.mxu1 %v3242_v49 }
 0x589   :  { %3022 = vmatprep.subr.bf16.mxu1 %v3378_v0 }
 0x58c   :  { %3023 = vmatpush3.bf16.msra.mxu1 %v3243_v34 }
 0x58d   :  { %3024 = vmatprep.subr.bf16.mxu1 %v3378_v0 }
 0x590   :  { %3025 = vmatpush3.bf16.msra.mxu1 %v3244_v35 }
 0x591   :  { %3044 = vmatprep.subr.bf16.mxu1 %v3378_v0 }
 0x656   :  { %v1124_v50 = vpop.f32.mrb[36].mxu1 }
 0x657   :  { %v1131_v51 = vadd.f32 %v1124_v50, %v3475_v3  ;;  %v3008_v52 = vpop.f32.mrb[37].mxu1 }
 0x658   :  { %v1127_v26 = vpop.f32.mrb[38].mxu1 }
 0x659   :  { %v1144_v53 = vmul.f32 %v1131_v51, %v1131_v51  ;;  %v1132_v54 = vadd.f32 %v1127_v26, %v3477_v4  ;;  %v3009_v55 = vpop.f32.mrb[39].mxu1  ;;  %v1133_v56 = vsel %vm95_vm1, %v1131_v51, 0.0 }
 0x65b   :  { %v1134_v57 = vsel %vm95_vm1, %v1132_v54, 0.0  ;;  %v1145_v58 = vmul.f32 %v1132_v54, %v1132_v54  ;;  %v1146_v60 = vsel %vm95_vm1, %v1144_v53, 0.0 }
 0x65c   :  { %v1135_v59 = vadd.f32 %v1134_v57, %v1133_v56 }
 0x65d   :  { %v1147_v61 = vsel %vm95_vm1, %v1145_v58, 0.0 }
 0x65e   :  { %v1136_v62 = vrot.slane %v1135_v59, 4  ;;  %v1148_v63 = vadd.f32 %v1147_v61, %v1146_v60 }
 0x660   :  { %v1137_v1 = vadd.f32 %v1136_v62, %v1135_v59  ;;  %v1149_v3 = vrot.slane %v1148_v63, 4 }
 0x662   :  { %v1138_v2 = vrot.slane %v1137_v1, 2  ;;  %v1150_v5 = vadd.f32 %v1149_v3, %v1148_v63 }
 0x664   :  { %v1139_v6 = vadd.f32 %v1138_v2, %v1137_v1  ;;  %v1151_v8 = vrot.slane %v1150_v5, 2 }
 0x666   :  { %v1140_v4 = vrot.slane %v1139_v6, 1  ;;  %v1152_v9 = vadd.f32 %v1151_v8, %v1150_v5 }
 0x668   :  { %v1141_v10 = vadd.f32 %v1140_v4, %v1139_v6  ;;  %v1153_v25 = vrot.slane %v1152_v9, 1 }
 0x66a   :  { %v1143_v7 = vmul.f32 0.0625, %v1141_v10  ;;  %v1154_v30 = vadd.f32 %v1153_v25, %v1152_v9 }
 0x66c   :  { %v1155_v11 = vmul.f32 0.0625, %v1154_v30  ;;  %v1156_v12 = vmul.f32 %v1143_v7, %v1143_v7  ;;  %v1159_v13 = vsub.f32 %v1131_v51, %v1143_v7  ;;  %v1160_v14 = vsub.f32 %v1132_v54, %v1143_v7 }
 0x66e   :  { %v1157_v15 = vsub.f32 %v1155_v11, %v1156_v12 }
 0x670   :  { %v1158_v16 = vmax.f32 %v1157_v15, 0.0 }
 0x672   :  { %v1161_v19 = vadd.f32 1e-05, %v1158_v16 }
 0x674   :  { %3287 = vrsqrt.f32 %v1161_v19  ;;  %v2742_v19 = vld [vmem:[%s4033_s9] ss:$0 sm:$0xff] }
 0x67e   :  { %v3288_v20 = vpop.eup %3287 }
 0x67f   :  { %v1163_v22 = vmul.f32 %v3288_v20, %v1159_v13  ;;  %v1164_v23 = vmul.f32 %v3288_v20, %v1160_v14 }
 0x681   :  { %v1171_v27 = vmul.f32 %v2730_v21, %v1163_v22  ;;  %v1172_v28 = vmul.f32 %v2730_v21, %v1164_v23  ;;  %v2743_v22 = vld [vmem:[%s4034_s10] ss:$0 sm:$0xff] }
 0x683   :  { %v1179_v29 = vadd.f32 %v2731_v24, %v1171_v27  ;;  %v1180_v32 = vadd.f32 %v2731_v24, %v1172_v28 }
 0x685   :  { %v1181_v33 = vpack.c.bf16 %v1180_v32, %v1179_v29 }
 0x687   :  { %3015 = vmatmul.mubr.msk.bf16.vlgmr.msra.gmra.mrb[32].mxu0 %vm95_vm1, %v1181_v33 }
 0x688   :  { %3034 = vmatprep.mubr.msk.bf16.mxu0 %vm3379_vm0, %v3378_v0  ;;  %3031 = vmatpush3.bf16.msra.mxu0 %v3245_v43 }
 0x689   :  { %3032 = vmatprep.subr.bf16.mxu0 %v3378_v0 }
 0x68c   :  { %3033 = vmatpush3.bf16.msra.mxu0 %v3246_v44 }
 0x68d   :  { %3038 = vmatprep.subr.bf16.mxu0 %v3378_v0 }
 0x75a   :  { %v1237_v31 = vpop.f32.mrb[32].mxu0 }
 0x75b   :  { %v1238_v37 = vadd.f32 %v2732_v36, %v1237_v31  ;;  %v3016_v38 = vpop.f32.mrb[33].mxu0 }
 0x75c   :  { %v1240_v39 = vpop.f32.mrb[34].mxu0 }
 0x75d   :  { %v1241_v40 = vadd.f32 %v2732_v36, %v1240_v39  ;;  %v3017_v41 = vpop.f32.mrb[35].mxu0  ;;  %v1244_v42 = vmax.f32 %v1238_v37, 0.0 }
 0x75f   :  { %v1245_v17 = vmax.f32 %v1241_v40, 0.0 }
 0x761   :  { %v1246_v18 = vpack.c.bf16 %v1245_v17, %v1244_v42 }
 0x763   :  { %3027 = vmatmul.mubr.msk.bf16.vlgmr.msra.gmra.mrb[40].mxu1 %vm1277_vm6, %v1246_v18 }
 0x764   :  { %3046 = vmatprep.mubr.msk.bf16.mxu1 %vm3379_vm0, %v3378_v0 }
 0x836   :  { %v1315_v46 = vpop.f32.mrb[40].mxu1 }
 0x837   :  { %v1316_v47 = vadd.f32 %v2736_v45, %v1315_v46  ;;  %v3028_v48 = vpop.f32.mrb[41].mxu1 }
 0x838   :  { %v1318_v49 = vpop.f32.mrb[42].mxu1 }
 0x839   :  { %v1322_v50 = vadd.f32 %v1316_v47, %v1179_v29  ;;  %v1319_v51 = vadd.f32 %v2736_v45, %v1318_v49  ;;  %v3029_v52 = vpop.f32.mrb[43].mxu1 }
 0x83b   :  { %v1334_v26 = vmul.f32 %v1322_v50, %v1322_v50  ;;  %v1323_v53 = vadd.f32 %v1319_v51, %v1180_v32  ;;  %v1324_v54 = vsel %vm95_vm1, %v1322_v50, 0.0 }
 0x83d   :  { %v1325_v55 = vsel %vm95_vm1, %v1323_v53, 0.0  ;;  %v1335_v56 = vmul.f32 %v1323_v53, %v1323_v53  ;;  %v1336_v58 = vsel %vm95_vm1, %v1334_v26, 0.0 }
 0x83e   :  { %v1326_v57 = vadd.f32 %v1325_v55, %v1324_v54 }
 0x83f   :  { %v1337_v59 = vsel %vm95_vm1, %v1335_v56, 0.0 }
 0x840   :  { %v1327_v60 = vrot.slane %v1326_v57, 4  ;;  %v1338_v61 = vadd.f32 %v1337_v59, %v1336_v58 }
 0x842   :  { %v1328_v62 = vadd.f32 %v1327_v60, %v1326_v57  ;;  %v1339_v63 = vrot.slane %v1338_v61, 4 }
 0x844   :  { %v1329_v1 = vrot.slane %v1328_v62, 2  ;;  %v1340_v3 = vadd.f32 %v1339_v63, %v1338_v61 }
 0x846   :  { %v1330_v2 = vadd.f32 %v1329_v1, %v1328_v62  ;;  %v1341_v5 = vrot.slane %v1340_v3, 2 }
 0x848   :  { %v1331_v6 = vrot.slane %v1330_v2, 1  ;;  %v1342_v8 = vadd.f32 %v1341_v5, %v1340_v3 }
 0x84a   :  { %v1332_v4 = vadd.f32 %v1331_v6, %v1330_v2  ;;  %v1343_v9 = vrot.slane %v1342_v8, 1 }
 0x84c   :  { %v1333_v10 = vmul.f32 0.0625, %v1332_v4  ;;  %v1344_v25 = vadd.f32 %v1343_v9, %v1342_v8 }
 0x84e   :  { %v1345_v7 = vmul.f32 0.0625, %v1344_v25  ;;  %v1346_v30 = vmul.f32 %v1333_v10, %v1333_v10  ;;  %v1349_v11 = vsub.f32 %v1322_v50, %v1333_v10  ;;  %v1350_v12 = vsub.f32 %v1323_v53, %v1333_v10 }
 0x850   :  { %v1347_v13 = vsub.f32 %v1345_v7, %v1346_v30 }
 0x852   :  { %v1348_v14 = vmax.f32 %v1347_v13, 0.0 }
 0x854   :  { %v1351_v15 = vadd.f32 1e-05, %v1348_v14 }
 0x856   :  { %3289 = vrsqrt.f32 %v1351_v15 }
 0x860   :  { %v3290_v16 = vpop.eup %3289 }
 0x861   :  { %v1353_v20 = vmul.f32 %v3290_v16, %v1349_v11  ;;  %v1354_v21 = vmul.f32 %v3290_v16, %v1350_v12 }
 0x863   :  { %v1361_v23 = vmul.f32 %v2742_v19, %v1353_v20  ;;  %v1362_v24 = vmul.f32 %v2742_v19, %v1354_v21 }
 0x865   :  { %v3749_v27 = vadd.f32 %v2743_v22, %v1362_v24  ;;  %v3751_v28 = vadd.f32 %v2743_v22, %v1361_v23 }
 0x867   :  { %v1407_v29 = vpack.c.bf16 %v3749_v27, %v3751_v28 }
 0x869   :  { %3035 = vmatmul.mubr.msk.bf16.vlgmr.msra.gmra.mrb[36].mxu0 %vm95_vm1, %v1407_v29 }
 0x86a   :  { %3040 = vmatprep.mubr.msk.bf16.mxu0 %vm3379_vm0, %v3378_v0 }
 0x93c   :  { %v1457_v32 = vpop.f32.mrb[36].mxu0 }
 0x93d   :  { %v3036_v33 = vpop.f32.mrb[37].mxu0  ;;  %v1484_v31 = vpack.c.bf16 %v1457_v32, %v1457_v32 }
 0x93e   :  { %v1460_v34 = vpop.f32.mrb[38].mxu0 }
 0x93f   :  { %v3037_v35 = vpop.f32.mrb[39].mxu0  ;;  %v3210_v36 = vpack.i.bf16 %v1460_v34, %v1457_v32  ;;  %v1485_v37 = vpack.c.bf16 %v1460_v34, %v1460_v34 }
 0x941   :  { %3211 = vrot.lane.b32.xlu1 %v3210_v36, %s3383_s18  ;;  %3206 = vrot.lane.b32.xlu0 %v3210_v36, %s3381_s16 }
 0x945   :  { %1493 = vrot.lane.b32.xlu1 %v1484_v31, %s3382_s17  ;;  %3216 = vrot.lane.b32.xlu0 %v3210_v36, %s3380_s15 }
 0x949   :  { %1542 = vrot.lane.b32.xlu0 %v1485_v37, %s3382_s17 }
 0x9b3   :  { %v3212_v38 = vpop.permute.xlu1 %3211  ;;  %v3207_v39 = vpop.permute.xlu0 %3206 }
 0x9b4   :  { %v3209_v40 = vunpack.i.h.bf16 %v3207_v39  ;;  %v3208_v41 = vunpack.i.l.bf16 %v3207_v39  ;;  %v3214_v42 = vunpack.i.h.bf16 %v3212_v38  ;;  %v3213_v17 = vunpack.i.l.bf16 %v3212_v38 }
 0x9b6   :  { %v3763_v18 = vpack.c.bf16 %v3209_v40, %v3209_v40  ;;  %v3765_v43 = vpack.c.bf16 %v3208_v41, %v3208_v41  ;;  %v3772_v47 = vpack.c.bf16 %v3214_v42, %v3214_v42  ;;  %v3774_v48 = vpack.c.bf16 %v3213_v17, %v3213_v17 }
 0x9b7   :  { %v1494_v44 = vpop.permute.xlu1 %1493  ;;  %v3217_v45 = vpop.permute.xlu0 %3216 }
 0x9b8   :  { %v1499_v46 = vsel %vm171_vm2, %v1494_v44, 0  ;;  %1591 = vrot.lane.b32.xlu1 %v3765_v43, %s3382_s17  ;;  %1640 = vrot.lane.b32.xlu0 %v3763_v18, %s3382_s17  ;;  %v3218_v49 = vunpack.i.l.bf16 %v3217_v45  ;;  %v3219_v50 = vunpack.i.h.bf16 %v3217_v45 }
 0x9b9   :  { %3039 = vmatpush3.bf16.xpose.msra.mxu0 %v1499_v46 }
 0x9ba   :  { %3050 = vmatprep.subr.bf16.mxu0 %v3378_v0  ;;  %v3782_v26 = vpack.c.bf16 %v3218_v49, %v3218_v49  ;;  %v3785_v53 = vpack.c.bf16 %v3219_v50, %v3219_v50 }
 0x9bb   :  { %v1543_v51 = vpop.permute.xlu0 %1542 }
 0x9bc   :  { %v1548_v52 = vsel %vm171_vm2, %v1543_v51, 0  ;;  %1689 = vrot.lane.b32.xlu1 %v3774_v48, %s3382_s17  ;;  %1738 = vrot.lane.b32.xlu0 %v3772_v47, %s3382_s17 }
 0x9bd   :  { %3045 = vmatpush3.bf16.xpose.msra.mxu1 %v1548_v52 }
 0x9be   :  { %3056 = vmatprep.subr.bf16.mxu1 %v3378_v0 }
 0x9c0   :  { %3041 = vmatmul.mubr.msk.bf16.vlgmr.msra.gmra.mrb[40].mxu0 %vm171_vm2, %v1484_v31  ;;  %1787 = vrot.lane.b32.xlu1 %v3782_v26, %s3382_s17 }
 0x9c1   :  { %1836 = vrot.lane.b32.xlu0 %v3785_v53, %s3382_s17  ;;  %3052 = vmatprep.mubr.msk.bf16.mxu0 %vm3379_vm0, %v3378_v0  ;;  %s3387_s17 = smov [#allocation5]  }
 0x9c2   :  { %s2696_s18 = sshll.u32 %s3387_s17, 4  ;;  %s2697_s18 = int_to_ptr.vmem [resolvable:$true] %s2696_s18 }
 0x9c3   :  { %p3354_p9 = scmp.lt.s32.totalorder %s2697_s18, %s2697_s18 }
 0x9c4   :  { %2028 = vrot.lane.b32.xlu1 %v1485_v37, %s3384_s19  ;;  %3047 = vmatmul.mubr.msk.bf16.vlgmr.msra.gmra.mrb[44].mxu1 %vm171_vm2, %v1485_v37 }
 0x9c5   :  { %1980 = vrot.lane.b32.xlu0 %v1484_v31, %s3384_s19  ;;  %3058 = vmatprep.mubr.msk.bf16.mxu1 %vm3379_vm0, %v3378_v0 }
 0xa2a   :  { %v1592_v54 = vpop.permute.xlu1 %1591  ;;  %v1641_v55 = vpop.permute.xlu0 %1640 }
 0xa2b   :  { %v1597_v56 = vsel %vm171_vm2, %v1592_v54, 0  ;;  %v1646_v57 = vsel %vm171_vm2, %v1641_v55, 0 }
 0xa2c   :  { %3051 = vmatpush3.bf16.xpose.msra.mxu0 %v1597_v56  ;;  %3057 = vmatpush3.bf16.xpose.msra.mxu1 %v1646_v57 }
 0xa2d   :  { %3062 = vmatprep.subr.bf16.mxu0 %v3378_v0  ;;  %3068 = vmatprep.subr.bf16.mxu1 %v3378_v0 }
 0xa2e   :  { %v1690_v58 = vpop.permute.xlu1 %1689  ;;  %v1739_v59 = vpop.permute.xlu0 %1738 }
 0xa2f   :  { %v1695_v60 = vsel %vm171_vm2, %v1690_v58, 0  ;;  %v1744_v61 = vsel %vm171_vm2, %v1739_v59, 0 }
 0xa32   :  { %v1788_v62 = vpop.permute.xlu1 %1787 }
 0xa33   :  { %3053 = vmatmul.mubr.msk.bf16.vlgmr.msra.gmra.mrb[44].mxu0 %vm171_vm2, %v3765_v43  ;;  %3059 = vmatmul.mubr.msk.bf16.vlgmr.msra.gmra.mrb[48].mxu1 %vm171_vm2, %v3763_v18  ;;  %v1837_v63 = vpop.permute.xlu0 %1836  ;;  %v1793_v1 = vsel %vm171_vm2, %v1788_v62, 0 }
 0xa34   :  { %3063 = vmatpush3.bf16.xpose.msra.mxu0 %v1695_v60  ;;  %3069 = vmatpush3.bf16.xpose.msra.mxu1 %v1744_v61  ;;  %v1842_v3 = vsel %vm171_vm2, %v1837_v63, 0 }
 0xa35   :  { %3064 = vmatprep.mubr.msk.bf16.mxu0 %vm3379_vm0, %v3378_v0  ;;  %3070 = vmatprep.mubr.msk.bf16.mxu1 %vm3379_vm0, %v3378_v0 }
 0xa36   :  { %3074 = vmatprep.subr.bf16.mxu0 %v3378_v0  ;;  %3080 = vmatprep.subr.bf16.mxu1 %v3378_v0  ;;  %v2029_v2 = vpop.permute.xlu1 %2028 }
 0xa37   :  { %v1981_v5 = vpop.permute.xlu0 %1980  ;;  %v2034_v6 = vsel %vm662_vm3, %v2029_v2, 0 }
 0xa38   :  { %v1986_v8 = vsel %vm662_vm3, %v1981_v5, 0 }
 0xa3b   :  { %3065 = vmatmul.mubr.msk.bf16.vlgmr.msra.gmra.mrb[48].mxu0 %vm171_vm2, %v3774_v48  ;;  %3071 = vmatmul.mubr.msk.bf16.vlgmr.msra.gmra.mrb[52].mxu1 %vm171_vm2, %v3772_v47 }
 0xa3c   :  { %3075 = vmatpush3.bf16.xpose.msra.mxu0 %v1793_v1  ;;  %3081 = vmatpush3.bf16.xpose.msra.mxu1 %v1842_v3 }
 0xa3d   :  { %3076 = vmatprep.mubr.msk.bf16.mxu0 %vm3379_vm0, %v3378_v0  ;;  %3082 = vmatprep.mubr.msk.bf16.mxu1 %vm3379_vm0, %v3378_v0 }
 0xa3e   :  { %3086 = vmatprep.subr.bf16.mxu0 %v3378_v0  ;;  %3092 = vmatprep.subr.bf16.mxu1 %v3378_v0 }
 0xa43   :  { %3077 = vmatmul.mubr.msk.bf16.vlgmr.msra.gmra.mrb[52].mxu0 %vm171_vm2, %v3782_v26  ;;  %3083 = vmatmul.mubr.msk.bf16.vlgmr.msra.gmra.mrb[56].mxu1 %vm171_vm2, %v3785_v53 }
 0xa44   :  { %3087 = vmatpush3.bf16.msra.mxu0 %v1986_v8  ;;  %3093 = vmatpush3.bf16.msra.mxu1 %v2034_v6 }
 0xa45   :  { %3088 = vmatprep.mubr.msk.bf16.mxu0 %vm3379_vm0, %v3378_v0  ;;  %3094 = vmatprep.mubr.msk.bf16.mxu1 %vm3379_vm0, %v3378_v0 }
 0xa46   :  { %3098 = vmatprep.subr.bf16.mxu0 %v3378_v0  ;;  %3104 = vmatprep.subr.bf16.mxu1 %v3378_v0 }
 0xa93   :  { %v1535_v4 = vpop.f32.mrb[40].mxu0 }
 0xa94   :  { %v3042_v9 = vpop.f32.mrb[41].mxu0  ;;  %v1884_v10 = vsel %vm171_vm2, %v1535_v4, -inf }
 0xa95   :  { %1885 = vmax.xlane.f32.xlu1 %v1884_v10  ;;  %v1538_v25 = vpop.f32.mrb[42].mxu0 }
 0xa96   :  { %v3043_v7 = vpop.f32.mrb[43].mxu0 }
 0xa97   :  { %v1584_v30 = vpop.f32.mrb[44].mxu1 }
 0xa98   :  { %v3048_v11 = vpop.f32.mrb[45].mxu1  ;;  %v1887_v12 = vsel %vm171_vm2, %v1584_v30, -inf }
 0xa99   :  { %1888 = vmax.xlane.f32.xlu0 %v1887_v12  ;;  %v1587_v13 = vpop.f32.mrb[46].mxu1 }
 0xa9a   :  { %v3049_v14 = vpop.f32.mrb[47].mxu1 }
 0xb06   :  { %v1633_v15 = vpop.f32.mrb[44].mxu0  ;;  %v1682_v16 = vpop.f32.mrb[48].mxu1 }
 0xb07   :  { %v3054_v19 = vpop.f32.mrb[45].mxu0  ;;  %v3060_v20 = vpop.f32.mrb[49].mxu1  ;;  %v1890_v21 = vsel %vm171_vm2, %v1633_v15, -inf  ;;  %v1893_v22 = vsel %vm171_vm2, %v1682_v16, -inf }
 0xb08   :  { %v1636_v23 = vpop.f32.mrb[46].mxu0  ;;  %1891 = vmax.xlane.f32.xlu0 %v1890_v21  ;;  %1894 = vmax.xlane.f32.xlu1 %v1893_v22  ;;  %v1685_v24 = vpop.f32.mrb[50].mxu1 }
 0xb09   :  { %v3055_v29 = vpop.f32.mrb[47].mxu0  ;;  %v3061_v32 = vpop.f32.mrb[51].mxu1 }
 0xb0e   :  { %v3843_v33 = vpop.f32.mrb[48].mxu0  ;;  %v1780_v34 = vpop.f32.mrb[52].mxu1 }
 0xb0f   :  { %v3066_v35 = vpop.f32.mrb[49].mxu0  ;;  %v3072_v36 = vpop.f32.mrb[53].mxu1  ;;  %v1896_v31 = vsel %vm171_vm2, %v3843_v33, -inf  ;;  %v1899_v37 = vsel %vm171_vm2, %v1780_v34, -inf }
 0xb10   :  { %v1734_v38 = vpop.f32.mrb[50].mxu0  ;;  %1897 = vmax.xlane.f32.xlu0 %v1896_v31  ;;  %1900 = vmax.xlane.f32.xlu1 %v1899_v37  ;;  %v1783_v39 = vpop.f32.mrb[54].mxu1 }
 0xb11   :  { %v3067_v40 = vpop.f32.mrb[51].mxu0  ;;  %v3073_v41 = vpop.f32.mrb[55].mxu1 }
 0xb16   :  { %v3848_v42 = vpop.f32.mrb[52].mxu0  ;;  %v1878_v17 = vpop.f32.mrb[56].mxu1 }
 0xb17   :  { %v3078_v44 = vpop.f32.mrb[53].mxu0  ;;  %v3084_v45 = vpop.f32.mrb[57].mxu1  ;;  %v1902_v46 = vsel %vm171_vm2, %v3848_v42, -inf  ;;  %v1905_v49 = vsel %vm171_vm2, %v1878_v17, -inf }
 0xb18   :  { %v1832_v50 = vpop.f32.mrb[54].mxu0  ;;  %1903 = vmax.xlane.f32.xlu0 %v1902_v46  ;;  %1906 = vmax.xlane.f32.xlu1 %v1905_v49  ;;  %v1881_v51 = vpop.f32.mrb[58].mxu1 }
 0xb19   :  { %v3079_v52 = vpop.f32.mrb[55].mxu0  ;;  %v3085_v54 = vpop.f32.mrb[59].mxu1 }
 0xb22   :  { %v1886_v55 = vpop.xlane.xlu1 %1885 }
 0xb23   :  { %v1908_v57 = vsub.f32 %v1535_v4, %v1886_v55 }
 0xb25   :  { %v1916_v59 = vmul.f32 1.442695, %v1908_v57 }
 0xb26   :  { %v1889_v56 = vpop.xlane.xlu0 %1888 }
 0xb27   :  { %v1909_v58 = vsub.f32 %v1584_v30, %v1889_v56  ;;  %3291 = vpow2.f32 %v1916_v59 }
 0xb29   :  { %2076 = vrot.lane.b32.xlu1 %v3765_v43, %s3384_s19  ;;  %v1918_v60 = vmul.f32 1.442695, %v1909_v58 }
 0xb2b   :  { %3293 = vpow2.f32 %v1918_v60 }
 0xb2e   :  { %2124 = vrot.lane.b32.xlu0 %v3763_v18, %s3384_s19 }
 0xb31   :  { %v3292_v61 = vpop.eup %3291 }
 0xb32   :  { %v1932_v63 = vsel %vm171_vm2, %v3292_v61, 0.0 }
 0xb35   :  { %v3294_v62 = vpop.eup %3293 }
 0xb36   :  { %v1935_v1 = vsel %vm171_vm2, %v3294_v62, 0.0 }
 0xb4d   :  { %1933 = vadd.xlane.f32.xlu0 %v1932_v63  ;;  %1936 = vadd.xlane.f32.xlu1 %v1935_v1 }
 0xb5e   :  { %2172 = vrot.lane.b32.xlu1 %v3774_v48, %s3384_s19 }
 0xb95   :  { %v1892_v18 = vpop.xlane.xlu0 %1891  ;;  %v1895_v43 = vpop.xlane.xlu1 %1894 }
 0xb96   :  { %v1910_v3 = vsub.f32 %v1633_v15, %v1892_v18  ;;  %v1911_v2 = vsub.f32 %v1682_v16, %v1895_v43 }
 0xb98   :  { %v1920_v5 = vmul.f32 1.442695, %v1910_v3  ;;  %v1922_v6 = vmul.f32 1.442695, %v1911_v2 }
 0xb9a   :  { %3295 = vpow2.f32 %v1920_v5 }
 0xb9b   :  { %3297 = vpow2.f32 %v1922_v6 }
 0xb9d   :  { %v1901_v8 = vpop.xlane.xlu1 %1900  ;;  %v1898_v19 = vpop.xlane.xlu0 %1897 }
 0xb9e   :  { %v1913_v4 = vsub.f32 %v1780_v34, %v1901_v8  ;;  %v1912_v20 = vsub.f32 %v3843_v33, %v1898_v19 }
 0xba0   :  { %v1926_v9 = vmul.f32 1.442695, %v1913_v4  ;;  %v1924_v22 = vmul.f32 1.442695, %v1912_v20 }
 0xba2   :  { %3299 = vpow2.f32 %v1926_v9 }
 0xba4   :  { %v3861_v10 = vpop.eup %3295 }
 0xba5   :  { %v3863_v25 = vpop.eup %3297  ;;  %v1907_v7 = vpop.xlane.xlu1 %1906  ;;  %v1938_v48 = vsel %vm171_vm2, %v3861_v10, 0.0 }
 0xba6   :  { %v1915_v30 = vsub.f32 %v1878_v17, %v1907_v7  ;;  %1939 = vadd.xlane.f32.xlu0 %v1938_v48  ;;  %v1941_v11 = vsel %vm171_vm2, %v3863_v25, 0.0  ;;  %v1904_v21 = vpop.xlane.xlu0 %1903 }
 0xba7   :  { %1942 = vadd.xlane.f32.xlu1 %v1941_v11  ;;  %v1914_v23 = vsub.f32 %v3848_v42, %v1904_v21 }
 0xba8   :  { %v1930_v12 = vmul.f32 1.442695, %v1915_v30 }
 0xba9   :  { %v1928_v24 = vmul.f32 1.442695, %v1914_v23  ;;  %v2077_v32 = vpop.permute.xlu1 %2076 }
 0xbaa   :  { %3301 = vpow2.f32 %v1930_v12  ;;  %v2125_v29 = vpop.permute.xlu0 %2124  ;;  %v2082_v42 = vsel %vm662_vm3, %v2077_v32, 0 }
 0xbab   :  { %3303 = vpow2.f32 %v1924_v22  ;;  %v2130_v17 = vsel %vm662_vm3, %v2125_v29, 0 }
 0xbac   :  { %v3869_v13 = vpop.eup %3299  ;;  %3305 = vpow2.f32 %v1928_v24 }
 0xbad   :  { %v1947_v14 = vsel %vm171_vm2, %v3869_v13, 0.0 }
 0xbae   :  { %1948 = vadd.xlane.f32.xlu1 %v1947_v14 }
 0xbb4   :  { %v3873_v15 = vpop.eup %3301 }
 0xbb5   :  { %v1953_v16 = vsel %vm171_vm2, %v3873_v15, 0.0  ;;  %v3883_v34 = vpop.eup %3303 }
 0xbb6   :  { %1954 = vadd.xlane.f32.xlu1 %v1953_v16  ;;  %v3887_v33 = vpop.eup %3305 }
 0xbbc   :  { %2220 = vrot.lane.b32.xlu0 %v3772_v47, %s3384_s19  ;;  %v1944_v47 = vsel %vm171_vm2, %v3883_v34, 0.0 }
 0xbc7   :  { %2268 = vrot.lane.b32.xlu1 %v3782_v26, %s3384_s19  ;;  %v1950_v26 = vsel %vm171_vm2, %v3887_v33, 0.0 }
 0xbda   :  { %v1934_v35 = vpop.xlane.xlu0 %1933  ;;  %v1937_v36 = vpop.xlane.xlu1 %1936 }
 0xbdb   :  { %3307 = vrcp.f32 %v1934_v35  ;;  %1945 = vadd.xlane.f32.xlu0 %v1944_v47 }
 0xbdc   :  { %3309 = vrcp.f32 %v1937_v36 }
 0xbde   :  { %v2173_v44 = vpop.permute.xlu1 %2172 }
 0xbdf   :  { %1951 = vadd.xlane.f32.xlu0 %v1950_v26  ;;  %v2178_v58 = vsel %vm662_vm3, %v2173_v44, 0 }
 0xbe5   :  { %v3308_v31 = vpop.eup %3307 }
 0xbe6   :  { %v3310_v37 = vpop.eup %3309  ;;  %v1964_v38 = vmul.f32 %v3308_v31, %v3292_v61  ;;  %v3247_v31 = vld [vmem:[%s4026_s2 + $0x10] sm:$0xff]  }
 0xbe7   :  { %v1965_v39 = vmul.f32 %v3310_v37, %v3294_v62 }
 0xbe8   :  { %v1972_v40 = vpack.c.bf16 %v1964_v38, %v1964_v38 }
 0xbe9   :  { %v1973_v41 = vpack.c.bf16 %v1965_v39, %v1965_v39 }
 0xbea   :  { %3089 = vmatmul.mubr.msk.bf16.vlgmr.msra.gmra.mrb[56].mxu0 %vm171_vm2, %v1972_v40 }
 0xbeb   :  { %3095 = vmatmul.mubr.msk.bf16.vlgmr.msra.gmra.mrb[60].mxu1 %vm171_vm2, %v1973_v41  ;;  %3099 = vmatpush3.bf16.msra.mxu0 %v2082_v42  ;;  %v3248_v42 = vld [vmem:[%s4026_s2 + $0x18] sm:$0xff]   ;;  %s3349_s2 = scalar_lea.vmem %s2697_s18, 256 }
 0xbec   :  { %3105 = vmatpush3.bf16.msra.mxu1 %v2130_v17  ;;  %3100 = vmatprep.mubr.msk.bf16.mxu0 %vm3379_vm0, %v3378_v0  ;;  %p3350_p8 = scmp.ne.s32.totalorder %s2697_s18, %s3349_s2  ;;  %p3355_p10 = scmp.lt.s32.totalorder %s3349_s2, %s3349_s2 }
 0xbed   :  { %3106 = vmatprep.mubr.msk.bf16.mxu1 %vm3379_vm0, %v3378_v0  ;;  %3110 = vmatprep.subr.bf16.mxu0 %v3378_v0 }
 0xbee   :  { %3116 = vmatprep.subr.bf16.mxu1 %v3378_v0  ;;  %p3356_p11 = por %p3355_p10, %p3354_p9 }
 0xbf0   :  { %p3357_p12 = pnand %p3356_p11, %p3350_p8 }
 0xbf5   :  { %2316 = vrot.lane.b32.xlu0 %v3785_v53, %s3384_s19 }
 0xc33   :  { %v1940_v45 = vpop.xlane.xlu0 %1939 }
 0xc34   :  { %3311 = vrcp.f32 %v1940_v45  ;;  %v1943_v46 = vpop.xlane.xlu1 %1942 }
 0xc35   :  { %3313 = vrcp.f32 %v1943_v46 }
 0xc37   :  { %v2221_v55 = vpop.permute.xlu0 %2220 }
 0xc38   :  { %v2226_v53 = vsel %vm662_vm3, %v2221_v55, 0 }
 0xc3b   :  { %v1949_v49 = vpop.xlane.xlu1 %1948 }
 0xc3c   :  { %3315 = vrcp.f32 %v1949_v49 }
 0xc3e   :  { %v3312_v50 = vpop.eup %3311 }
 0xc3f   :  { %v3314_v51 = vpop.eup %3313  ;;  %v1966_v52 = vmul.f32 %v3312_v50, %v3861_v10 }
 0xc40   :  { %v1967_v54 = vmul.f32 %v3314_v51, %v3863_v25 }
 0xc41   :  { %v1974_v56 = vpack.c.bf16 %v1966_v52, %v1966_v52 }
 0xc42   :  { %v1975_v57 = vpack.c.bf16 %v1967_v54, %v1967_v54 }
 0xc43   :  { %3101 = vmatmul.mubr.msk.bf16.vlgmr.msra.gmra.mrb[60].mxu0 %vm171_vm2, %v1974_v56  ;;  %v1955_v62 = vpop.xlane.xlu1 %1954 }
 0xc44   :  { %3107 = vmatmul.mubr.msk.bf16.vlgmr.msra.gmra.mrb[64].mxu1 %vm171_vm2, %v1975_v57  ;;  %3111 = vmatpush3.bf16.msra.mxu0 %v2178_v58  ;;  %3317 = vrcp.f32 %v1955_v62 }
 0xc45   :  { %3117 = vmatpush3.bf16.msra.mxu1 %v2226_v53  ;;  %3118 = vmatprep.mubr.msk.bf16.mxu1 %vm3379_vm0, %v3378_v0 }
 0xc46   :  { %3128 = vmatprep.subr.bf16.mxu1 %v3378_v0  ;;  %3112 = vmatprep.mubr.msk.bf16.mxu0 %vm3379_vm0, %v3378_v0  ;;  %v3316_v59 = vpop.eup %3315 }
 0xc47   :  { %3122 = vmatprep.subr.bf16.mxu0 %v3378_v0  ;;  %v1969_v60 = vmul.f32 %v3316_v59, %v3869_v13  ;;  %v2269_v4 = vpop.permute.xlu1 %2268 }
 0xc48   :  { %v2274_v25 = vsel %vm662_vm3, %v2269_v4, 0  ;;  %v3251_v4 = vld [vmem:[%s4031_s7 + $0x20] sm:$0xff]  }
 0xc49   :  { %v1977_v61 = vpack.c.bf16 %v1969_v60, %v1969_v60 }
 0xc4c   :  { %3119 = vmatmul.mubr.msk.bf16.vlgmr.msra.gmra.mrb[68].mxu1 %vm171_vm2, %v1977_v61 }
 0xc4d   :  { %3130 = vmatprep.mubr.msk.bf16.mxu1 %vm3379_vm0, %v3378_v0 }
 0xc4e   :  { %v3318_v1 = vpop.eup %3317 }
 0xc4f   :  { %v1971_v43 = vmul.f32 %v3318_v1, %v3873_v15 }
 0xc51   :  { %v1979_v6 = vpack.c.bf16 %v1971_v43, %v1971_v43 }
 0xc68   :  { %v1946_v63 = vpop.xlane.xlu0 %1945 }
 0xc69   :  { %3319 = vrcp.f32 %v1946_v63 }
 0xc6c   :  { %v1952_v18 = vpop.xlane.xlu0 %1951 }
 0xc6d   :  { %3321 = vrcp.f32 %v1952_v18 }
 0xc70   :  { %v2317_v3 = vpop.permute.xlu0 %2316 }
 0xc71   :  { %v2322_v2 = vsel %vm662_vm3, %v2317_v3, 0 }
 0xc72   :  { %3129 = vmatpush3.bf16.msra.mxu1 %v2322_v2 }
 0xc73   :  { %v3320_v5 = vpop.eup %3319  ;;  %3142 = vmatprep.subr.bf16.mxu1 %v3378_v0 }
 0xc74   :  { %v1968_v8 = vmul.f32 %v3320_v5, %v3883_v34 }
 0xc75   :  { %3131 = vmatmul.mubr.msk.bf16.vlgmr.msra.gmra.mrb[72].mxu1 %vm171_vm2, %v1979_v6  ;;  %v3249_v6 = vld [vmem:[%s4029_s5 + $0x10] sm:$0xff]  }
 0xc76   :  { %v1976_v9 = vpack.c.bf16 %v1968_v8, %v1968_v8  ;;  %3146 = vmatprep.mubr.msk.bf16.mxu1 %vm3379_vm0, %v3378_v0  ;;  %3143 = vmatpush3.bf16.msra.mxu1 %v3249_v6  ;;  %v3250_v8 = vld [vmem:[%s4029_s5 + $0x18] sm:$0xff]  }
 0xc77   :  { %v3322_v10 = vpop.eup %3321  ;;  %3144 = vmatprep.subr.bf16.mxu1 %v3378_v0 }
 0xc78   :  { %3113 = vmatmul.mubr.msk.bf16.vlgmr.msra.gmra.mrb[64].mxu0 %vm171_vm2, %v1976_v9  ;;  %v1970_v7 = vmul.f32 %v3322_v10, %v3887_v33  ;;  %v3252_v9 = vld [vmem:[%s4031_s7 + $0x28] sm:$0xff]  }
 0xc79   :  { %3123 = vmatpush3.bf16.msra.mxu0 %v2274_v25  ;;  %3124 = vmatprep.mubr.msk.bf16.mxu0 %vm3379_vm0, %v3378_v0 }
 0xc7a   :  { %3134 = vmatprep.subr.bf16.mxu0 %v3378_v0  ;;  %v1978_v48 = vpack.c.bf16 %v1970_v7, %v1970_v7  ;;  %3145 = vmatpush3.bf16.msra.mxu1 %v3250_v8 }
 0xc80   :  { %3125 = vmatmul.mubr.msk.bf16.vlgmr.msra.gmra.mrb[68].mxu0 %vm171_vm2, %v1978_v48 }
 0xc81   :  { %3138 = vmatprep.mubr.msk.bf16.mxu0 %vm3379_vm0, %v3378_v0  ;;  %3135 = vmatpush3.bf16.msra.mxu0 %v3247_v31 }
 0xc82   :  { %3136 = vmatprep.subr.bf16.mxu0 %v3378_v0 }
 0xc85   :  { %3137 = vmatpush3.bf16.msra.mxu0 %v3248_v42 }
 0xc86   :  { %3150 = vmatprep.subr.bf16.mxu0 %v3378_v0 }
 0xcbd   :  { %v2022_v30 = vpop.f32.mrb[56].mxu0 }
 0xcbe   :  { %v2070_v11 = vpop.f32.mrb[60].mxu1  ;;  %v3090_v12 = vpop.f32.mrb[57].mxu0 }
 0xcbf   :  { %v3096_v13 = vpop.f32.mrb[61].mxu1  ;;  %v2025_v14 = vpop.f32.mrb[58].mxu0 }
 0xcc0   :  { %v2073_v15 = vpop.f32.mrb[62].mxu1  ;;  %v3091_v16 = vpop.f32.mrb[59].mxu0 }
 0xcc1   :  { %v3097_v19 = vpop.f32.mrb[63].mxu1 }
 0xd16   :  { %v2118_v20 = vpop.f32.mrb[60].mxu0 }
 0xd17   :  { %v2166_v21 = vpop.f32.mrb[64].mxu1  ;;  %v3102_v22 = vpop.f32.mrb[61].mxu0 }
 0xd18   :  { %v3220_v23 = vpack.i.bf16 %v2166_v21, %v2118_v20  ;;  %v3108_v24 = vpop.f32.mrb[65].mxu1  ;;  %v2121_v29 = vpop.f32.mrb[62].mxu0 }
 0xd19   :  { %v2169_v32 = vpop.f32.mrb[66].mxu1  ;;  %v3103_v34 = vpop.f32.mrb[63].mxu0 }
 0xd1a   :  { %3221 = vrot.lane.b32.xlu1 %v3220_v23, %s3377_s28  ;;  %v3109_v35 = vpop.f32.mrb[67].mxu1 }
 0xd1f   :  { %v2262_v36 = vpop.f32.mrb[68].mxu1 }
 0xd20   :  { %v3120_v47 = vpop.f32.mrb[69].mxu1 }
 0xd21   :  { %v2265_v33 = vpop.f32.mrb[70].mxu1 }
 0xd22   :  { %v3121_v26 = vpop.f32.mrb[71].mxu1 }
 0xd48   :  { %v2358_v37 = vpop.f32.mrb[72].mxu1 }
 0xd49   :  { %v3132_v38 = vpop.f32.mrb[73].mxu1 }
 0xd4a   :  { %v2361_v39 = vpop.f32.mrb[74].mxu1 }
 0xd4b   :  { %v2214_v40 = vpop.f32.mrb[64].mxu0  ;;  %v3133_v41 = vpop.f32.mrb[75].mxu1 }
 0xd4c   :  { %v3225_v17 = vpack.i.bf16 %v2262_v36, %v2214_v40  ;;  %v3114_v44 = vpop.f32.mrb[65].mxu0 }
 0xd4d   :  { %v2217_v45 = vpop.f32.mrb[66].mxu0  ;;  %v2792_v44 = vld [vmem:[%s4027_s3 + $0x1] ss:$0 sm:$0xff] }
 0xd4e   :  { %v3115_v46 = vpop.f32.mrb[67].mxu0  ;;  %3226 = vrot.lane.b32.xlu0 %v3225_v17, %s3385_s24 }
 0xd53   :  { %v2310_v49 = vpop.f32.mrb[68].mxu0 }
 0xd54   :  { %v3230_v50 = vpack.i.bf16 %v2358_v37, %v2310_v49  ;;  %v3126_v51 = vpop.f32.mrb[69].mxu0  ;;  %v2793_v49 = vld [vmem:[%s4028_s4 + $0x1] ss:$0 sm:$0xff] }
 0xd55   :  { %v2313_v52 = vpop.f32.mrb[70].mxu0 }
 0xd56   :  { %v3127_v54 = vpop.f32.mrb[71].mxu0  ;;  %3231 = vrot.lane.b32.xlu1 %v3230_v50, %s3386_s25 }
 0xd8c   :  { %v3222_v55 = vpop.permute.xlu1 %3221 }
 0xd8d   :  { %v3224_v57 = vunpack.i.h.bf16 %v3222_v55  ;;  %v3223_v58 = vunpack.i.l.bf16 %v3222_v55 }
 0xd8f   :  { %v2389_v61 = vsel %vm171_vm2, %v2070_v11, %v3224_v57  ;;  %v2388_v62 = vsel %vm171_vm2, %v2022_v30, %v3223_v58  ;;  %v3254_v57 = vld [vmem:[%s4031_s7 + $0x38] sm:$0xff]   ;;  %v2794_v58 = vld [vmem:[%s4030_s6 + $0x1] ss:$0 sm:$0xff] }
 0xdc0   :  { %v3227_v56 = vpop.permute.xlu0 %3226 }
 0xdc1   :  { %v3229_v53 = vunpack.i.h.bf16 %v3227_v56  ;;  %v3228_v59 = vunpack.i.l.bf16 %v3227_v56  ;;  %v3253_v56 = vld [vmem:[%s4031_s7 + $0x30] sm:$0xff]  }
 0xdc3   :  { %v2391_v18 = vsel %vm1068_vm4, %v2389_v61, %v3229_v53  ;;  %v2390_v43 = vsel %vm1068_vm4, %v2388_v62, %v3228_v59 }
 0xdc8   :  { %v3232_v60 = vpop.permute.xlu1 %3231 }
 0xdc9   :  { %v3234_v63 = vunpack.i.h.bf16 %v3232_v60  ;;  %v3233_v1 = vunpack.i.l.bf16 %v3232_v60 }
 0xdcb   :  { %v2393_v3 = vsel %vm1071_vm5, %v2391_v18, %v3234_v63  ;;  %v2392_v2 = vsel %vm1071_vm5, %v2390_v43, %v3233_v1 }
 0xdcc   :  { %v2394_v5 = vpack.c.bf16 %v2393_v3, %v2392_v2 }
 0xdce   :  { %3139 = vmatmul.mubr.msk.bf16.vlgmr.msra.gmra.mrb[72].mxu0 %vm95_vm1, %v2394_v5 }
 0xdcf   :  { %3158 = vmatprep.mubr.msk.bf16.mxu0 %vm3379_vm0, %v3378_v0  ;;  %3151 = vmatpush3.bf16.msra.mxu0 %v3251_v4 }
 0xdd0   :  { %3152 = vmatprep.subr.bf16.mxu0 %v3378_v0 }
 0xdd3   :  { %3153 = vmatpush3.bf16.msra.mxu0 %v3252_v9 }
 0xdd4   :  { %3154 = vmatprep.subr.bf16.mxu0 %v3378_v0 }
 0xdd7   :  { %3155 = vmatpush3.bf16.msra.mxu0 %v3253_v56 }
 0xdd8   :  { %3156 = vmatprep.subr.bf16.mxu0 %v3378_v0  ;;  %v2798_v0 = vld [vmem:[%s4032_s8 + $0x1] ss:$0 sm:$0xff] }
 0xddb   :  { %3157 = vmatpush3.bf16.msra.mxu0 %v3254_v57 }
 0xea1   :  { %v2444_v10 = vpop.f32.mrb[72].mxu0 }
 0xea2   :  { %v2451_v25 = vadd.f32 %v2444_v10, %v3751_v28  ;;  %v3140_v7 = vpop.f32.mrb[73].mxu0 }
 0xea3   :  { %v2447_v48 = vpop.f32.mrb[74].mxu0 }
 0xea4   :  { %v2463_v30 = vmul.f32 %v2451_v25, %v2451_v25  ;;  %v2452_v11 = vadd.f32 %v2447_v48, %v3749_v27  ;;  %v3141_v12 = vpop.f32.mrb[75].mxu0  ;;  %v2453_v13 = vsel %vm95_vm1, %v2451_v25, 0.0 }
 0xea6   :  { %v2454_v14 = vsel %vm95_vm1, %v2452_v11, 0.0  ;;  %v2464_v15 = vmul.f32 %v2452_v11, %v2452_v11  ;;  %v2465_v19 = vsel %vm95_vm1, %v2463_v30, 0.0 }
 0xea7   :  { %v2455_v16 = vadd.f32 %v2454_v14, %v2453_v13 }
 0xea8   :  { %v2466_v20 = vsel %vm95_vm1, %v2464_v15, 0.0 }
 0xea9   :  { %v2456_v21 = vrot.slane %v2455_v16, 4  ;;  %v2467_v22 = vadd.f32 %v2466_v20, %v2465_v19 }
 0xeab   :  { %v2457_v23 = vadd.f32 %v2456_v21, %v2455_v16  ;;  %v2468_v28 = vrot.slane %v2467_v22, 4 }
 0xead   :  { %v2458_v24 = vrot.slane %v2457_v23, 2  ;;  %v2469_v29 = vadd.f32 %v2468_v28, %v2467_v22 }
 0xeaf   :  { %v2459_v32 = vadd.f32 %v2458_v24, %v2457_v23  ;;  %v2470_v34 = vrot.slane %v2469_v29, 2 }
 0xeb1   :  { %v2460_v27 = vrot.slane %v2459_v32, 1  ;;  %v2471_v35 = vadd.f32 %v2470_v34, %v2469_v29 }
 0xeb3   :  { %v2461_v36 = vadd.f32 %v2460_v27, %v2459_v32  ;;  %v2472_v47 = vrot.slane %v2471_v35, 1 }
 0xeb5   :  { %v2462_v33 = vmul.f32 0.0625, %v2461_v36  ;;  %v2473_v26 = vadd.f32 %v2472_v47, %v2471_v35 }
 0xeb7   :  { %v2474_v31 = vmul.f32 0.0625, %v2473_v26  ;;  %v2475_v37 = vmul.f32 %v2462_v33, %v2462_v33  ;;  %v2478_v38 = vsub.f32 %v2451_v25, %v2462_v33  ;;  %v2479_v39 = vsub.f32 %v2452_v11, %v2462_v33 }
 0xeb9   :  { %v2476_v40 = vsub.f32 %v2474_v31, %v2475_v37 }
 0xebb   :  { %v2477_v41 = vmax.f32 %v2476_v40, 0.0 }
 0xebd   :  { %v2480_v42 = vadd.f32 1e-05, %v2477_v41 }
 0xebf   :  { %3323 = vrsqrt.f32 %v2480_v42  ;;  %v2805_v42 = vld [vmem:[%s4034_s10 + $0x1] ss:$0 sm:$0xff] }
 0xec9   :  { %v3324_v17 = vpop.eup %3323 }
 0xeca   :  { %v2482_v45 = vmul.f32 %v3324_v17, %v2478_v38  ;;  %v2483_v46 = vmul.f32 %v3324_v17, %v2479_v39  ;;  %v2804_v39 = vld [vmem:[%s4033_s9 + $0x1] ss:$0 sm:$0xff] }
 0xecc   :  { %v2490_v50 = vmul.f32 %v2792_v44, %v2482_v45  ;;  %v2491_v51 = vmul.f32 %v2792_v44, %v2483_v46 }
 0xece   :  { %v2498_v52 = vadd.f32 %v2793_v49, %v2490_v50  ;;  %v2499_v54 = vadd.f32 %v2793_v49, %v2491_v51 }
 0xed0   :  { %v2500_v55 = vpack.c.bf16 %v2499_v54, %v2498_v52 }
 0xed2   :  { %3147 = vmatmul.mubr.msk.bf16.vlgmr.msra.gmra.mrb[76].mxu1 %vm95_vm1, %v2500_v55 }
 0xfa5   :  { %v2556_v53 = vpop.f32.mrb[76].mxu1 }
 0xfa6   :  { %v2557_v59 = vadd.f32 %v2794_v58, %v2556_v53  ;;  %v3148_v60 = vpop.f32.mrb[77].mxu1 }
 0xfa7   :  { %v2559_v61 = vpop.f32.mrb[78].mxu1 }
 0xfa8   :  { %v2560_v62 = vadd.f32 %v2794_v58, %v2559_v61  ;;  %v3149_v63 = vpop.f32.mrb[79].mxu1  ;;  %v2563_v1 = vmax.f32 %v2557_v59, 0.0 }
 0xfaa   :  { %v2564_v18 = vmax.f32 %v2560_v62, 0.0 }
 0xfac   :  { %v2565_v43 = vpack.c.bf16 %v2564_v18, %v2563_v1 }
 0xfae   :  { %3159 = vmatmul.mubr.msk.bf16.vlgmr.msra.gmra.mrb[76].mxu0 %vm1277_vm6, %v2565_v43 }
0x1081   :  { %v2633_v3 = vpop.f32.mrb[76].mxu0 }
0x1082   :  { %v2634_v2 = vadd.f32 %v2798_v0, %v2633_v3  ;;  %v3160_v5 = vpop.f32.mrb[77].mxu0 }
0x1083   :  { %v2636_v6 = vpop.f32.mrb[78].mxu0 }
0x1084   :  { %v2640_v8 = vadd.f32 %v2634_v2, %v2498_v52  ;;  %v2637_v4 = vadd.f32 %v2798_v0, %v2636_v6  ;;  %v3161_v9 = vpop.f32.mrb[79].mxu0 }
0x1086   :  { %v2652_v10 = vmul.f32 %v2640_v8, %v2640_v8  ;;  %v2641_v25 = vadd.f32 %v2637_v4, %v2499_v54  ;;  %v2642_v7 = vsel %vm95_vm1, %v2640_v8, 0.0 }
0x1088   :  { %v2643_v48 = vsel %vm95_vm1, %v2641_v25, 0.0  ;;  %v2653_v30 = vmul.f32 %v2641_v25, %v2641_v25  ;;  %v2654_v12 = vsel %vm95_vm1, %v2652_v10, 0.0 }
0x1089   :  { %v2644_v11 = vadd.f32 %v2643_v48, %v2642_v7 }
0x108a   :  { %v2655_v13 = vsel %vm95_vm1, %v2653_v30, 0.0 }
0x108b   :  { %v2645_v14 = vrot.slane %v2644_v11, 4  ;;  %v2656_v15 = vadd.f32 %v2655_v13, %v2654_v12 }
0x108d   :  { %v2646_v16 = vadd.f32 %v2645_v14, %v2644_v11  ;;  %v2657_v19 = vrot.slane %v2656_v15, 4 }
0x108f   :  { %v2647_v20 = vrot.slane %v2646_v16, 2  ;;  %v2658_v21 = vadd.f32 %v2657_v19, %v2656_v15 }
0x1091   :  { %v2648_v22 = vadd.f32 %v2647_v20, %v2646_v16  ;;  %v2659_v23 = vrot.slane %v2658_v21, 2 }
0x1093   :  { %v2649_v28 = vrot.slane %v2648_v22, 1  ;;  %v2660_v24 = vadd.f32 %v2659_v23, %v2658_v21 }
0x1095   :  { %v2650_v29 = vadd.f32 %v2649_v28, %v2648_v22  ;;  %v2661_v32 = vrot.slane %v2660_v24, 1 }
0x1097   :  { %v2651_v34 = vmul.f32 0.0625, %v2650_v29  ;;  %v2662_v27 = vadd.f32 %v2661_v32, %v2660_v24 }
0x1099   :  { %v2663_v35 = vmul.f32 0.0625, %v2662_v27  ;;  %v2664_v36 = vmul.f32 %v2651_v34, %v2651_v34  ;;  %v2668_v47 = vsub.f32 %v2641_v25, %v2651_v34  ;;  %v2667_v33 = vsub.f32 %v2640_v8, %v2651_v34 }
0x109b   :  { %v2665_v26 = vsub.f32 %v2663_v35, %v2664_v36 }
0x109d   :  { %v2666_v31 = vmax.f32 %v2665_v26, 0.0 }
0x109f   :  { %v2669_v37 = vadd.f32 1e-05, %v2666_v31 }
0x10a1   :  { %3325 = vrsqrt.f32 %v2669_v37 }
0x10ab   :  { %v3326_v38 = vpop.eup %3325 }
0x10ac   :  { %v2672_v40 = vmul.f32 %v3326_v38, %v2668_v47  ;;  %v2671_v41 = vmul.f32 %v3326_v38, %v2667_v33 }
0x10ae   :  { %v2679_v17 = vmul.f32 %v2804_v39, %v2671_v41  ;;  %v2680_v44 = vmul.f32 %v2804_v39, %v2672_v40 }
0x10b0   :  { %v2687_v45 = vadd.f32 %v2805_v42, %v2679_v17  ;;  %v2688_v46 = vadd.f32 %v2805_v42, %v2680_v44 }
0x10b2   :  { %2689 = vst.msk [vmem:[#allocation5] sm:$0xff] %vm95_vm1, %v2687_v45  ;;  %2690 = vst.msk [vmem:[#allocation5 + $0x8] sm:$0xff] %vm95_vm1, %v2688_v46 }
0x10b3   :  { %3360 = shalt.err (!%p3357_p12)
}
0x10b4   :  { %s3361_s19 = scalar_lea.hbm %s4035_s11, 256 }
0x10b5   :  { %p3362_p13 = scmp.ne.s32.totalorder %s4035_s11, %s3361_s19  ;;  %p3365_p0 = scmp.lt.u32.totalorder %s3361_s19, %s4035_s11 }
0x10b7   :  { %p3367_p1 = pnand %p3365_p0, %p3362_p13 }
0x10b9   :  { %3370 = shalt.err (!%p3367_p1)
}
0x10ba   :  { %2702 = dma.vmem_to_hbm [thread:$0]  %s2697_s18, 256, %s4035_s11, [#allocation4], %s3376_s27, %s3376_s27, %s3377_s28  }
0x10bb   :  { %3373 = dma.done.wait [#allocation4], 256  }
0x10bc   :  { %3374 = vsyncadd [#allocation4], 4294967040 }
0x10bd   :  { %2706 = vsyncpa [#allocation3], 1 }
0x10be   :  { %2707 = vsyncpa [#allocation4], 1 }

</bundles_post_ra>
